<compile_context>
chip_gen: v6e
topology: v6e:2x2x1
jax: 0.10.0
libtpu: 0.0.40
codegen_flags: <defaults>
</compile_context>

<pallas_src>
import math
from functools import partial

import jax
import jax.numpy as jnp
from jax.experimental import pallas as pl
from jax.experimental.pallas import tpu as pltpu


# -----------------------------------------------------------------------------
# helpers
# -----------------------------------------------------------------------------
def _round_up(x, m):
    return ((x + m - 1) // m) * m


_VMEM_BUDGET = 20 * 1024 * 1024     # per-kernel tile footprint target
_VMEM_LIMIT = 48 * 1024 * 1024      # scoped VMEM limit (safe on v5e/v6e/v7x)


# -----------------------------------------------------------------------------
# Pallas kernels: matmul with fused bias + per-output-channel PReLU epilogue.
# bf16 operands on the MXU, f32 accumulation, cast to out dtype on store.
# -----------------------------------------------------------------------------
def _mm_fused_kernel(a_ref, b_ref, bias_ref, alpha_ref, o_ref):
    """Single K-step: no accumulator scratch, epilogue fused into the store."""
    y = jnp.dot(a_ref[...], b_ref[...], preferred_element_type=jnp.float32)
    y = y + bias_ref[...]                     # (tm, N) + (1, N)
    alpha = alpha_ref[...]                    # (1, N);  alpha==1 -> exact linear
    o_ref[...] = jnp.where(y >= 0.0, y, alpha * y).astype(o_ref.dtype)


def _mm_fused_multik_kernel(a_ref, b_ref, bias_ref, alpha_ref, o_ref, acc_ref):
    @pl.when(pl.program_id(1) == 0)
    def _init():
        acc_ref[...] = jnp.zeros_like(acc_ref)

    acc_ref[...] += jnp.dot(a_ref[...], b_ref[...],
                            preferred_element_type=jnp.float32)

    @pl.when(pl.program_id(1) == pl.num_programs(1) - 1)
    def _fin():
        y = acc_ref[...] + bias_ref[...]
        alpha = alpha_ref[...]
        o_ref[...] = jnp.where(y >= 0.0, y, alpha * y).astype(o_ref.dtype)


def _single_k_footprint(tm, K, N, out_bytes):
    # double-buffered bf16 A + bf16 B + output + (tiny) bias/alpha
    return 2 * (tm * K + K * N) * 2 + 2 * tm * N * out_bytes + 8 * N * 4


def matmul_bias_act(a, b, bias, alpha, out_dtype=jnp.float32):
    """out = prelu(a @ b + bias, alpha);  a:(M,K)  b:(K,N)  bias,alpha:(N,).
    No pad / slice copies: N and K blocks use the full (possibly unaligned)
    extents, M edge blocks are partial."""
    M, K = a.shape
    _, N = b.shape
    a = a.astype(jnp.bfloat16)
    b = b.astype(jnp.bfloat16)
    bias2 = bias.astype(jnp.float32).reshape(1, N)
    alpha2 = alpha.astype(jnp.float32).reshape(1, N)
    out_bytes = jnp.dtype(out_dtype).itemsize

    # ---- single-K-step fast path -------------------------------------------
    tm = None
    if M <= 1024 and _single_k_footprint(M, K, N, out_bytes) <= _VMEM_BUDGET:
        tm = M
    else:
        cand = 1024
        while cand >= 128:
            if _single_k_footprint(cand, K, N, out_bytes) <= _VMEM_BUDGET:
                tm = cand
                break
            cand //= 2
    if tm is not None:
        return pl.pallas_call(
            _mm_fused_kernel,
            out_shape=jax.ShapeDtypeStruct((M, N), out_dtype),
            grid_spec=pltpu.PrefetchScalarGridSpec(
                num_scalar_prefetch=0,
                grid=(pl.cdiv(M, tm),),
                in_specs=[
                    pl.BlockSpec((tm, K), lambda i: (i, 0)),
                    pl.BlockSpec((K, N), lambda i: (0, 0)),
                    pl.BlockSpec((1, N), lambda i: (0, 0)),
                    pl.BlockSpec((1, N), lambda i: (0, 0)),
                ],
                out_specs=pl.BlockSpec((tm, N), lambda i: (i, 0)),
            ),
            compiler_params=pltpu.CompilerParams(
                dimension_semantics=("parallel",),
                vmem_limit_bytes=_VMEM_LIMIT),
        )(a, b, bias2, alpha2)

    # ---- multi-K fallback (very large K; not hit at these model sizes) ------
    tk = 512
    Kp = _round_up(K, tk)
    if Kp != K:
        a = jnp.pad(a, ((0, 0), (0, Kp - K)))
        b = jnp.pad(b, ((0, Kp - K), (0, 0)))
    tm = 256
    return pl.pallas_call(
        _mm_fused_multik_kernel,
        out_shape=jax.ShapeDtypeStruct((M, N), out_dtype),
        grid_spec=pltpu.PrefetchScalarGridSpec(
            num_scalar_prefetch=0,
            grid=(pl.cdiv(M, tm), Kp // tk),
            in_specs=[
                pl.BlockSpec((tm, tk), lambda i, k: (i, k)),
                pl.BlockSpec((tk, N), lambda i, k: (k, 0)),
                pl.BlockSpec((1, N), lambda i, k: (0, 0)),
                pl.BlockSpec((1, N), lambda i, k: (0, 0)),
            ],
            out_specs=pl.BlockSpec((tm, N), lambda i, k: (i, 0)),
            scratch_shapes=[pltpu.VMEM((tm, N), jnp.float32)],
        ),
        compiler_params=pltpu.CompilerParams(
            dimension_semantics=("parallel", "arbitrary"),
            vmem_limit_bytes=_VMEM_LIMIT),
    )(a, b, bias2, alpha2)


# -----------------------------------------------------------------------------
# Pallas kernel: plain batched matmul (no epilogue) for the correlation volume
# -----------------------------------------------------------------------------
def _bmm_kernel(a_ref, b_ref, o_ref):
    o_ref[...] = jnp.dot(a_ref[...], b_ref[...],
                         preferred_element_type=jnp.float32)


def batched_matmul_pallas(a, b):
    """a:(B,M,K) @ b:(B,K,N) -> (B,M,N) f32; single K step; batch dim squeezed."""
    B, M, K = a.shape
    _, _, N = b.shape
    a = a.astype(jnp.bfloat16)
    b = b.astype(jnp.bfloat16)

    def tile(d, cap=512):
        if d <= cap:
            return d
        for t in (cap, cap // 2, cap // 4, 128):
            if d % t == 0:
                return t
        return 128

    tm = tile(M)
    tn = tile(N)
    return pl.pallas_call(
        _bmm_kernel,
        out_shape=jax.ShapeDtypeStruct((B, M, N), jnp.float32),
        grid_spec=pltpu.PrefetchScalarGridSpec(
            num_scalar_prefetch=0,
            grid=(B, pl.cdiv(M, tm), pl.cdiv(N, tn)),
            in_specs=[
                pl.BlockSpec((pl.Squeezed(), tm, K), lambda bb, i, j: (bb, i, 0)),
                pl.BlockSpec((pl.Squeezed(), K, tn), lambda bb, i, j: (bb, 0, j)),
            ],
            out_specs=pl.BlockSpec((pl.Squeezed(), tm, tn),
                                   lambda bb, i, j: (bb, i, j)),
        ),
        compiler_params=pltpu.CompilerParams(
            dimension_semantics=("parallel", "parallel", "parallel"),
            vmem_limit_bytes=_VMEM_LIMIT),
    )(a, b)


# -----------------------------------------------------------------------------
# conv2d (NHWC) via im2col + Pallas matmul; jitted so slicing/concat fuse.
# -----------------------------------------------------------------------------
@partial(jax.jit, static_argnames=("kh", "kw", "stride", "padding", "out_dtype"))
def conv2d_pallas(x, wmat, bias, alpha, *, kh, kw, stride, padding, out_dtype):
    """x:(N,H,W,Cin) NHWC, wmat:(kh*kw*Cin, Cout).  Returns (N,Ho,Wo,Cout)."""
    N, H, W, Cin = x.shape
    _, Cout = wmat.shape
    xb = x.astype(jnp.bfloat16)
    if padding > 0:
        xb = jnp.pad(xb, ((0, 0), (padding, padding), (padding, padding), (0, 0)))
    Ho = (H + 2 * padding - kh) // stride + 1
    Wo = (W + 2 * padding - kw) // stride + 1
    if kh == 1 and kw == 1:
        xs = xb[:, 0:(Ho - 1) * stride + 1:stride, 0:(Wo - 1) * stride + 1:stride, :]
        patches = xs.reshape(N * Ho * Wo, Cin)
    else:
        cols = []
        for i in range(kh):
            for j in range(kw):
                cols.append(xb[:, i:i + (Ho - 1) * stride + 1:stride,
                               j:j + (Wo - 1) * stride + 1:stride, :])
        patches = jnp.concatenate(cols, axis=-1).reshape(N * Ho * Wo, kh * kw * Cin)
    out = matmul_bias_act(patches, wmat, bias, alpha, out_dtype=out_dtype)
    return out.reshape(N, Ho, Wo, Cout)


# -----------------------------------------------------------------------------
# deterministic parameter construction
# -----------------------------------------------------------------------------
_PARAM_KEY = [jax.random.PRNGKey(1234)]


def _next_key():
    _PARAM_KEY[0], k = jax.random.split(_PARAM_KEY[0])
    return k


def _rand(shape, scale):
    return jax.random.normal(_next_key(), shape, jnp.float32) * scale


class ConvAct:
    """nn.Conv2d fused with PReLU / LeakyReLU / ReLU / linear in the kernel."""

    def __init__(self, cin, cout, k, s=1, p=0, act='linear', out_dtype=jnp.float32):
        w = _rand((cout, cin, k, k), 1.0 / math.sqrt(cin * k * k))
        # K layout = (kh, kw, Cin) channel-last -> matches NHWC im2col.
        self.wmat = jnp.transpose(w, (2, 3, 1, 0)).reshape(k * k * cin, cout).astype(jnp.bfloat16)
        self.b = jnp.zeros((cout,), jnp.float32)
        self.k, self.s, self.p = k, s, p
        self.out_dtype = out_dtype
        if act == 'prelu':
            a = 0.25
        elif act == 'lrelu':
            a = 0.1
        elif act == 'relu':
            a = 0.0
        else:
            a = 1.0      # alpha==1 -> exact identity epilogue (linear)
        self.alpha = jnp.full((cout,), a, jnp.float32)

    def __call__(self, x):
        return conv2d_pallas(x, self.wmat, self.b, self.alpha,
                             kh=self.k, kw=self.k, stride=self.s,
                             padding=self.p, out_dtype=self.out_dtype)


class ConvTranspose2d:
    """nn.ConvTranspose2d(cin,cout,4,2,1) via sub-pixel decomposition:
    one stride-1 3x3 conv producing 4*cout channels + pixel shuffle."""

    _TAPS = {0: ((0, 3), (1, 1)),   # even output row/col: (window pos, kernel tap)
             1: ((1, 2), (2, 0))}   # odd  output row/col

    def __init__(self, cin, cout, k=4, s=2, p=1, out_dtype=jnp.float32):
        assert (k, s, p) == (4, 2, 1)
        self.cin, self.cout = cin, cout
        self.out_dtype = out_dtype
        w = _rand((cin, cout, k, k), 1.0 / math.sqrt(cin * k * k))
        b = jnp.zeros((cout,), jnp.float32)
        w_eff = jnp.zeros((4, cout, cin, 3, 3), jnp.float32)
        for py in (0, 1):
            for px in (0, 1):
                g = py * 2 + px
                for (wr, kh_) in self._TAPS[py]:
                    for (wc, kw_) in self._TAPS[px]:
                        w_eff = w_eff.at[g, :, :, wr, wc].set(w[:, :, kh_, kw_].T)
        w_eff = w_eff.reshape(4 * cout, cin, 3, 3)
        self.wmat = jnp.transpose(w_eff, (2, 3, 1, 0)).reshape(9 * cin, 4 * cout).astype(jnp.bfloat16)
        self.b_eff = jnp.tile(b, 4)
        self.alpha = jnp.ones((4 * cout,), jnp.float32)

    def __call__(self, x):
        N, H, W, _ = x.shape
        y = conv2d_pallas(x, self.wmat, self.b_eff, self.alpha,
                          kh=3, kw=3, stride=1, padding=1, out_dtype=self.out_dtype)
        y = y.reshape(N, H, W, 2, 2, self.cout)       # (..., py, px, cout)
        y = jnp.transpose(y, (0, 1, 3, 2, 4, 5))      # (N, H, py, W, px, cout)
        return y.reshape(N, 2 * H, 2 * W, self.cout)


# -----------------------------------------------------------------------------
# small JAX glue ops (NHWC): norm / pool / resize / warp / grid-sample
# -----------------------------------------------------------------------------
def relu(x):
    return jnp.maximum(x, 0.0)


def instance_norm(x, eps=1e-5):
    # TODO(synk): could be fused with the conv epilogue via per-channel sum /
    # sum-sq side outputs to avoid the extra HBM passes.
    x = x.astype(jnp.float32)
    mean = x.mean(axis=(1, 2), keepdims=True)
    var = x.var(axis=(1, 2), keepdims=True)
    return (x - mean) * jax.lax.rsqrt(var + eps)


def avg_pool2(x):
    N, H, W, C = x.shape
    return x.reshape(N, H // 2, 2, W // 2, 2, C).mean(axis=(2, 4))


def resize(x, scale_factor):
    """F.interpolate(..., mode='bilinear', align_corners=False) on NHWC."""
    N, H, W, C = x.shape
    Ho = int(math.floor(H * scale_factor))
    Wo = int(math.floor(W * scale_factor))
    if Ho == H and Wo == W:
        return x
    ys = jnp.maximum((jnp.arange(Ho, dtype=jnp.float32) + 0.5) * (H / Ho) - 0.5, 0.0)
    xs = jnp.maximum((jnp.arange(Wo, dtype=jnp.float32) + 0.5) * (W / Wo) - 0.5, 0.0)
    y0 = jnp.floor(ys).astype(jnp.int32); y1 = jnp.minimum(y0 + 1, H - 1)
    x0 = jnp.floor(xs).astype(jnp.int32); x1 = jnp.minimum(x0 + 1, W - 1)
    wy = (ys - y0)[None, :, None, None]
    wx = (xs - x0)[None, None, :, None]
    r0 = x[:, y0]; r1 = x[:, y1]                      # (N, Ho, W, C)
    a = r0[:, :, x0]; b = r0[:, :, x1]
    c = r1[:, :, x0]; d = r1[:, :, x1]
    return a * (1 - wy) * (1 - wx) + b * (1 - wy) * wx + c * wy * (1 - wx) + d * wy * wx


def _gather_pix(img_flat, idx):
    # img_flat: (N, HW, C), idx: (N, P) -> (N, P, C)
    return jnp.take_along_axis(img_flat, idx[:, :, None], axis=1)


def sample_bilinear_zeros(img, x, y):
    """grid_sample(align_corners=True, padding_mode='zeros') at pixel coords, NHWC."""
    # TODO(synk): data-dependent gather stays in plain JAX (no BlockSpec form).
    N, H, W, C = img.shape
    spatial = x.shape[1:]
    P = 1
    for s in spatial:
        P *= s
    img_flat = img.reshape(N, H * W, C)
    x = x.reshape(N, P).astype(jnp.float32)
    y = y.reshape(N, P).astype(jnp.float32)
    x0 = jnp.floor(x); y0 = jnp.floor(y)
    wx1 = x - x0; wy1 = y - y0

    def corner(xc, yc, wgt):
        inb = (xc >= 0) & (xc <= W - 1) & (yc >= 0) & (yc <= H - 1)
        xi = jnp.clip(xc, 0, W - 1).astype(jnp.int32)
        yi = jnp.clip(yc, 0, H - 1).astype(jnp.int32)
        vals = _gather_pix(img_flat, yi * W + xi)
        return vals * (wgt * inb)[:, :, None]

    out = (corner(x0, y0, (1 - wx1) * (1 - wy1)) +
           corner(x0 + 1, y0, wx1 * (1 - wy1)) +
           corner(x0, y0 + 1, (1 - wx1) * wy1) +
           corner(x0 + 1, y0 + 1, wx1 * wy1))
    return out.reshape(N, *spatial, C)


def sample_bilinear_border(img, x, y):
    """grid_sample(align_corners=True, padding_mode='border') at pixel coords, NHWC."""
    N, H, W, C = img.shape
    spatial = x.shape[1:]
    P = 1
    for s in spatial:
        P *= s
    img_flat = img.reshape(N, H * W, C)
    x = jnp.clip(x.reshape(N, P).astype(jnp.float32), 0.0, W - 1.0)
    y = jnp.clip(y.reshape(N, P).astype(jnp.float32), 0.0, H - 1.0)
    x0 = jnp.floor(x); y0 = jnp.floor(y)
    wx1 = x - x0; wy1 = y - y0

    def corner(xc, yc, wgt):
        xi = jnp.clip(xc, 0, W - 1).astype(jnp.int32)
        yi = jnp.clip(yc, 0, H - 1).astype(jnp.int32)
        vals = _gather_pix(img_flat, yi * W + xi)
        return vals * wgt[:, :, None]

    out = (corner(x0, y0, (1 - wx1) * (1 - wy1)) +
           corner(x0 + 1, y0, wx1 * (1 - wy1)) +
           corner(x0, y0 + 1, (1 - wx1) * wy1) +
           corner(x0 + 1, y0 + 1, wx1 * wy1))
    return out.reshape(N, *spatial, C)


def warp(img, flow):
    """img, flow NHWC; flow in pixel units (matches AMT's normalized-grid warp)."""
    B, H, W, C = img.shape
    px = jnp.arange(W, dtype=jnp.float32)[None, None, :] + flow[..., 0]
    py = jnp.arange(H, dtype=jnp.float32)[None, :, None] + flow[..., 1]
    return sample_bilinear_border(img, px, py)


def coords_grid(b, h, w):
    gy, gx = jnp.meshgrid(jnp.arange(h, dtype=jnp.float32),
                          jnp.arange(w, dtype=jnp.float32), indexing='ij')
    coords = jnp.stack([gx, gy], axis=-1)             # (h, w, 2) -> (x, y)
    return jnp.broadcast_to(coords[None], (b, h, w, 2))


# -----------------------------------------------------------------------------
# sub-modules (reconstructed from the AMT reference implementation), NHWC
# -----------------------------------------------------------------------------
class ResBlock:
    """IFRNet-style ResBlock with side channels."""

    def __init__(self, in_ch, side_ch):
        bf = jnp.bfloat16
        self.side = side_ch
        self.conv1 = ConvAct(in_ch, in_ch, 3, 1, 1, 'prelu', out_dtype=bf)
        self.conv2 = ConvAct(side_ch, side_ch, 3, 1, 1, 'prelu', out_dtype=bf)
        self.conv3 = ConvAct(in_ch, in_ch, 3, 1, 1, 'prelu', out_dtype=bf)
        self.conv4 = ConvAct(side_ch, side_ch, 3, 1, 1, 'prelu', out_dtype=bf)
        self.conv5 = ConvAct(in_ch, in_ch, 3, 1, 1, 'linear', out_dtype=jnp.float32)
        self.prelu_alpha = jnp.full((in_ch,), 0.25, jnp.float32)

    def __call__(self, x):
        out = self.conv1(x)
        res, side = out[..., :-self.side], out[..., -self.side:]
        side = self.conv2(side)
        out = self.conv3(jnp.concatenate([res, side], axis=-1))
        res, side = out[..., :-self.side], out[..., -self.side:]
        side = self.conv4(side)
        out = self.conv5(jnp.concatenate([res, side], axis=-1))
        y = x.astype(jnp.float32) + out
        y = jnp.where(y >= 0.0, y, self.prelu_alpha * y)
        return y.astype(jnp.bfloat16)


class ResidualBlock:
    """RAFT-style residual block with instance norm (projection shortcut when
    the channel count OR stride changes)."""

    def __init__(self, cin, planes, stride=1):
        self.conv1 = ConvAct(cin, planes, 3, stride, 1, 'linear')
        self.conv2 = ConvAct(planes, planes, 3, 1, 1, 'linear')
        if stride != 1 or cin != planes:
            self.down = ConvAct(cin, planes, 1, stride, 0, 'linear')
        else:
            self.down = None

    def __call__(self, x):
        y = relu(instance_norm(self.conv1(x)))
        y = relu(instance_norm(self.conv2(y)))
        if self.down is not None:
            x = instance_norm(self.down(x))
        return relu(x + y)


class LargeEncoder:
    # TODO(synk): inner channel widths of AMT-G's LargeEncoder are reconstructed
    # approximations; /8 stride and output_dim=128 match the reference.
    def __init__(self, output_dim=128):
        self.conv1 = ConvAct(3, 64, 7, 2, 3, 'linear')
        self.blocks = [
            ResidualBlock(64, 64, 1), ResidualBlock(64, 64, 1),
            ResidualBlock(64, 96, 2), ResidualBlock(96, 96, 1),
            ResidualBlock(96, 128, 2), ResidualBlock(128, 128, 1),
            ResidualBlock(128, 160, 1), ResidualBlock(160, 160, 1),
        ]
        self.conv2 = ConvAct(160, output_dim, 1, 1, 0, 'linear',
                             out_dtype=jnp.bfloat16)

    def __call__(self, xs):
        bdim = xs[0].shape[0]
        x = jnp.concatenate(xs, axis=0)              # run both frames in one batch
        x = relu(instance_norm(self.conv1(x)))
        for blk in self.blocks:
            x = blk(x)
        x = self.conv2(x)
        return x[:bdim], x[bdim:]


class Encoder:
    def __init__(self, channels, large=True):
        bf = jnp.bfloat16
        self.pyramids = []
        prev = 3
        for idx, ch in enumerate(channels, 1):
            k = 7 if (large and idx == 1) else 3
            p = 3 if k == 7 else 1
            self.pyramids.append((ConvAct(prev, ch, k, 2, p, 'prelu', out_dtype=bf),
                                  ConvAct(ch, ch, 3, 1, 1, 'prelu', out_dtype=bf)))
            prev = ch

    def __call__(self, x):
        fs = []
        for c1, c2 in self.pyramids:
            x = c2(c1(x))
            fs.append(x)
        return fs


class InitDecoder:
    def __init__(self, in_ch, out_ch, skip_ch):
        self.conv = ConvAct(in_ch * 2 + 1, in_ch * 2, 3, 1, 1, 'prelu',
                            out_dtype=jnp.bfloat16)
        self.res = ResBlock(in_ch * 2, skip_ch)
        self.up = ConvTranspose2d(in_ch * 2, out_ch + 4)

    def __call__(self, f0, f1, embt):
        b, h, w, _ = f0.shape
        embt_map = jnp.broadcast_to(embt, (b, h, w, 1))
        out = self.up(self.res(self.conv(
            jnp.concatenate([f0, f1, embt_map], axis=-1))))
        return out[..., 0:2], out[..., 2:4], out[..., 4:]


class IntermediateDecoder:
    def __init__(self, in_ch, out_ch, skip_ch):
        self.conv = ConvAct(in_ch * 3 + 4, in_ch * 3, 3, 1, 1, 'prelu',
                            out_dtype=jnp.bfloat16)
        self.res = ResBlock(in_ch * 3, skip_ch)
        self.up = ConvTranspose2d(in_ch * 3, out_ch + 4)

    def __call__(self, ft_, f0, f1, flow0_in, flow1_in):
        f0w = warp(f0, flow0_in)
        f1w = warp(f1, flow1_in)
        x = jnp.concatenate([ft_, f0w, f1w, flow0_in, flow1_in], axis=-1)
        out = self.up(self.res(self.conv(x)))
        flow0 = out[..., 0:2] + 2.0 * resize(flow0_in, 2.0)
        flow1 = out[..., 2:4] + 2.0 * resize(flow1_in, 2.0)
        return flow0, flow1, out[..., 4:]


class MultiFlowDecoder:
    def __init__(self, in_ch, skip_ch, num_flows=3):
        self.n = num_flows
        self.conv = ConvAct(in_ch * 3 + 4, in_ch * 3, 3, 1, 1, 'prelu',
                            out_dtype=jnp.bfloat16)
        self.res = ResBlock(in_ch * 3, skip_ch)
        self.up = ConvTranspose2d(in_ch * 3, 8 * num_flows)

    def __call__(self, ft_, f0, f1, flow0, flow1):
        n = self.n
        f0w = warp(f0, flow0)
        f1w = warp(f1, flow1)
        out = self.up(self.res(self.conv(
            jnp.concatenate([ft_, f0w, f1w, flow0, flow1], axis=-1))))
        dflow0, dflow1 = out[..., :2 * n], out[..., 2 * n:4 * n]
        mask = jax.nn.sigmoid(out[..., 4 * n:5 * n])
        img_res = out[..., 5 * n:]
        flow0 = dflow0 + 2.0 * jnp.tile(resize(flow0, 2.0), (1, 1, 1, n))
        flow1 = dflow1 + 2.0 * jnp.tile(resize(flow1, 2.0), (1, 1, 1, n))
        return flow0, flow1, mask, img_res


class BasicUpdateBlock:
    def __init__(self, cdim, hidden_dim, flow_dim, corr_dim, corr_dim2, fc_dim,
                 corr_levels=4, radius=3, scale_factor=None, out_num=1):
        bf = jnp.bfloat16
        cor_planes = corr_levels * (2 * radius + 1) ** 2
        self.scale_factor = scale_factor
        self.convc1 = ConvAct(2 * cor_planes, corr_dim, 1, 1, 0, 'lrelu', out_dtype=bf)
        self.convc2 = ConvAct(corr_dim, corr_dim2, 3, 1, 1, 'lrelu', out_dtype=bf)
        self.convf1 = ConvAct(4, flow_dim * 2, 7, 1, 3, 'lrelu', out_dtype=bf)
        self.convf2 = ConvAct(flow_dim * 2, flow_dim, 3, 1, 1, 'lrelu', out_dtype=bf)
        self.conv = ConvAct(corr_dim2 + flow_dim, fc_dim, 3, 1, 1, 'lrelu', out_dtype=bf)
        self.gru1 = ConvAct(fc_dim + 4 + cdim, hidden_dim, 3, 1, 1, 'lrelu', out_dtype=bf)
        self.gru2 = ConvAct(hidden_dim, hidden_dim, 3, 1, 1, 'linear', out_dtype=bf)
        self.feat1 = ConvAct(hidden_dim, hidden_dim, 3, 1, 1, 'lrelu', out_dtype=bf)
        self.feat2 = ConvAct(hidden_dim, cdim, 3, 1, 1, 'linear', out_dtype=jnp.float32)
        self.flow1 = ConvAct(hidden_dim, hidden_dim, 3, 1, 1, 'lrelu', out_dtype=bf)
        self.flow2 = ConvAct(hidden_dim, 4 * out_num, 3, 1, 1, 'linear', out_dtype=jnp.float32)

    def __call__(self, net, flow, corr):
        sf = self.scale_factor
        net_ = resize(net, 1.0 / sf) if sf is not None else net
        cor = self.convc2(self.convc1(corr))
        flo = self.convf2(self.convf1(flow))
        inp = self.conv(jnp.concatenate([cor, flo], axis=-1))
        inp = jnp.concatenate([inp, flow, net_], axis=-1)
        out = self.gru2(self.gru1(inp))
        delta_net = self.feat2(self.feat1(out))
        delta_flow = self.flow2(self.flow1(out))
        if sf is not None:
            delta_net = resize(delta_net, sf)
            delta_flow = sf * resize(delta_flow, sf)
        return delta_net, delta_flow


class BidirCorrBlock:
    def __init__(self, fmap1, fmap2, num_levels=4, radius=4):
        self.num_levels = num_levels
        self.radius = radius
        B, H, W, D = fmap1.shape
        scale = 1.0 / math.sqrt(D)
        f1 = fmap1.reshape(B, H * W, D)
        f2 = fmap2.reshape(B, H * W, D)
        f1_t = jnp.transpose(f1, (0, 2, 1)).astype(jnp.float32) * scale
        f2_t = jnp.transpose(f2, (0, 2, 1)).astype(jnp.float32) * scale
        # Both directions via batched Pallas matmuls (no HWxHW transpose).
        corr = batched_matmul_pallas(f1, f2_t)       # (B, HW1, HW2)
        corr_T = batched_matmul_pallas(f2, f1_t)     # (B, HW2, HW1)
        corr = corr.reshape(B * H * W, H, W, 1)
        corr_T = corr_T.reshape(B * H * W, H, W, 1)
        self.pyr, self.pyr_T = [corr], [corr_T]
        for _ in range(num_levels - 1):
            corr = avg_pool2(corr)
            corr_T = avg_pool2(corr_T)
            self.pyr.append(corr)
            self.pyr_T.append(corr_T)
        self.shape = (B, H, W)

    def __call__(self, coords0, coords1):
        r = self.radius
        B, H1, W1 = self.shape
        d = jnp.arange(-r, r + 1, dtype=jnp.float32)
        dI, dJ = jnp.meshgrid(d, d, indexing='ij')
        c0 = coords0.reshape(B * H1 * W1, 1, 1, 2)
        c1 = coords1.reshape(B * H1 * W1, 1, 1, 2)
        outs, outs_T = [], []
        for lvl in range(self.num_levels):
            cen0 = c0 / (2 ** lvl)
            cen1 = c1 / (2 ** lvl)
            x0 = cen0[..., 0] + dJ[None]; y0 = cen0[..., 1] + dI[None]
            x1 = cen1[..., 0] + dJ[None]; y1 = cen1[..., 1] + dI[None]
            s0 = sample_bilinear_zeros(self.pyr[lvl], x0, y0)
            s1 = sample_bilinear_zeros(self.pyr_T[lvl], x1, y1)
            outs.append(s0.reshape(B, H1, W1, -1))
            outs_T.append(s1.reshape(B, H1, W1, -1))
        return (jnp.concatenate(outs, axis=-1),
                jnp.concatenate(outs_T, axis=-1))


def multi_flow_combine(comb_block, img0, img1, flow0, flow1, mask, img_res, mean_):
    b, h, w, c = flow0.shape
    n = c // 2

    def split_groups(t, gs):
        # (b,h,w,n*gs) with channel = f*gs + c  ->  (b*n,h,w,gs)
        return jnp.transpose(t.reshape(b, h, w, n, gs),
                             (0, 3, 1, 2, 4)).reshape(b * n, h, w, gs)

    flow0 = split_groups(flow0, 2)
    flow1 = split_groups(flow1, 2)
    mask = split_groups(mask, 1)
    img_res = split_groups(img_res, 3)
    img0_r = jnp.tile(img0[:, None], (1, n, 1, 1, 1)).reshape(b * n, h, w, 3)
    img1_r = jnp.tile(img1[:, None], (1, n, 1, 1, 1)).reshape(b * n, h, w, 3)
    mean_r = jnp.tile(mean_[:, None], (1, n, 1, 1, 1)).reshape(b * n, 1, 1, 1)
    img0_warp = warp(img0_r, flow0)
    img1_warp = warp(img1_r, flow1)
    img_warps = mask * img0_warp + (1.0 - mask) * img1_warp + mean_r + img_res
    img_warps = img_warps.reshape(b, n, h, w, 3)
    comb_in = jnp.transpose(img_warps, (0, 2, 3, 1, 4)).reshape(b, h, w, n * 3)
    return img_warps.mean(axis=1) + comb_block(comb_in)


# -----------------------------------------------------------------------------
# Model (AMT-G) -- NHWC internally, NCHW at the external boundary
# -----------------------------------------------------------------------------
class Model:
    def __init__(self, corr_radius=3, corr_lvls=4, num_flows=5,
                 channels=(84, 96, 112, 128), skip_channels=84):
        self.radius = corr_radius
        self.corr_levels = corr_lvls
        self.num_flows = num_flows
        self.feat_encoder = LargeEncoder(output_dim=128)
        self.encoder = Encoder(channels, large=True)
        self.decoder4 = InitDecoder(channels[3], channels[2], skip_channels)
        self.decoder3 = IntermediateDecoder(channels[2], channels[1], skip_channels)
        self.decoder2 = IntermediateDecoder(channels[1], channels[0], skip_channels)
        self.decoder1 = MultiFlowDecoder(channels[0], skip_channels, num_flows)
        self.update4 = self._get_updateblock(112, None)
        self.update3_low = self._get_updateblock(96, 2.0)
        self.update2_low = self._get_updateblock(84, 4.0)
        self.update3_high = self._get_updateblock(96, None)
        self.update2_high = self._get_updateblock(84, None)
        self.comb_1 = ConvAct(3 * num_flows, 6 * num_flows, 7, 1, 3, 'prelu',
                              out_dtype=jnp.bfloat16)
        self.comb_2 = ConvAct(6 * num_flows, 3, 7, 1, 3, 'linear')

    def _get_updateblock(self, cdim, scale_factor=None):
        return BasicUpdateBlock(cdim=cdim, hidden_dim=192, flow_dim=64,
                                corr_dim=256, corr_dim2=192, fc_dim=188,
                                scale_factor=scale_factor,
                                corr_levels=self.corr_levels, radius=self.radius)

    def comb_block(self, x):
        return self.comb_2(self.comb_1(x))

    def _corr_scale_lookup(self, corr_fn, coord, flow0, flow1, embt, downsample=1):
        t1_scale = 1.0 / embt
        t0_scale = 1.0 / (1.0 - embt)
        if downsample != 1:
            inv = 1.0 / downsample
            flow0 = inv * resize(flow0, inv)
            flow1 = inv * resize(flow1, inv)
        corr0, corr1 = corr_fn(coord + flow1 * t1_scale, coord + flow0 * t0_scale)
        corr = jnp.concatenate([corr0, corr1], axis=-1)
        flow = jnp.concatenate([flow0, flow1], axis=-1)
        return corr, flow

    def forward(self, img0, img1, embt, scale_factor=1.0, eval=False):
        # external NCHW -> internal NHWC
        img0 = jnp.transpose(img0, (0, 2, 3, 1))
        img1 = jnp.transpose(img1, (0, 2, 3, 1))
        mean_ = jnp.mean(jnp.concatenate([img0, img1], axis=1),
                         axis=(1, 2, 3), keepdims=True)
        img0 = img0 - mean_
        img1 = img1 - mean_
        img0_ = resize(img0, scale_factor) if scale_factor != 1.0 else img0
        img1_ = resize(img1, scale_factor) if scale_factor != 1.0 else img1
        b, h, w, _ = img0_.shape
        coord = coords_grid(b, h // 8, w // 8)

        fmap0, fmap1 = self.feat_encoder([img0_, img1_])
        corr_fn = BidirCorrBlock(fmap0, fmap1, radius=self.radius,
                                 num_levels=self.corr_levels)

        # context encoder once on a batch-concatenated input
        feats = self.encoder(jnp.concatenate([img0_, img1_], axis=0))
        (f0_1, f1_1), (f0_2, f1_2), (f0_3, f1_3), (f0_4, f1_4) = [
            (f[:b], f[b:]) for f in feats]

        up_flow0_4, up_flow1_4, ft_3_ = self.decoder4(f0_4, f1_4, embt)
        corr_4, flow_4 = self._corr_scale_lookup(corr_fn, coord, up_flow0_4,
                                                 up_flow1_4, embt, downsample=1)
        delta_ft_3_, delta_flow_4 = self.update4(ft_3_, flow_4, corr_4)
        up_flow0_4 = up_flow0_4 + delta_flow_4[..., 0:2]
        up_flow1_4 = up_flow1_4 + delta_flow_4[..., 2:4]
        ft_3_ = ft_3_ + delta_ft_3_

        up_flow0_3, up_flow1_3, ft_2_ = self.decoder3(ft_3_, f0_3, f1_3,
                                                      up_flow0_4, up_flow1_4)
        corr_3, flow_3 = self._corr_scale_lookup(corr_fn, coord, up_flow0_3,
                                                 up_flow1_3, embt, downsample=2)
        delta_ft_2_, delta_flow_3 = self.update3_low(ft_2_, flow_3, corr_3)
        up_flow0_3 = up_flow0_3 + delta_flow_3[..., 0:2]
        up_flow1_3 = up_flow1_3 + delta_flow_3[..., 2:4]
        ft_2_ = ft_2_ + delta_ft_2_

        corr_3 = resize(corr_3, scale_factor=2.0)
        up_flow_3 = jnp.concatenate([up_flow0_3, up_flow1_3], axis=-1)
        delta_ft_2_, delta_up_flow_3 = self.update3_high(ft_2_, up_flow_3, corr_3)
        ft_2_ = ft_2_ + delta_ft_2_
        up_flow0_3 = up_flow0_3 + delta_up_flow_3[..., 0:2]
        up_flow1_3 = up_flow1_3 + delta_up_flow_3[..., 2:4]

        up_flow0_2, up_flow1_2, ft_1_ = self.decoder2(ft_2_, f0_2, f1_2,
                                                      up_flow0_3, up_flow1_3)
        corr_2, flow_2 = self._corr_scale_lookup(corr_fn, coord, up_flow0_2,
                                                 up_flow1_2, embt, downsample=4)
        delta_ft_1_, delta_flow_2 = self.update2_low(ft_1_, flow_2, corr_2)
        up_flow0_2 = up_flow0_2 + delta_flow_2[..., 0:2]
        up_flow1_2 = up_flow1_2 + delta_flow_2[..., 2:4]
        ft_1_ = ft_1_ + delta_ft_1_

        corr_2 = resize(corr_2, scale_factor=4.0)
        up_flow_2 = jnp.concatenate([up_flow0_2, up_flow1_2], axis=-1)
        delta_ft_1_, delta_up_flow_2 = self.update2_high(ft_1_, up_flow_2, corr_2)
        ft_1_ = ft_1_ + delta_ft_1_
        up_flow0_2 = up_flow0_2 + delta_up_flow_2[..., 0:2]
        up_flow1_2 = up_flow1_2 + delta_up_flow_2[..., 2:4]

        up_flow0_1, up_flow1_1, mask, img_res = self.decoder1(
            ft_1_, f0_1, f1_1, up_flow0_2, up_flow1_2)

        if scale_factor != 1.0:
            up_flow0_1 = resize(up_flow0_1, 1.0 / scale_factor) * (1.0 / scale_factor)
            up_flow1_1 = resize(up_flow1_1, 1.0 / scale_factor) * (1.0 / scale_factor)
            mask = resize(mask, 1.0 / scale_factor)
            img_res = resize(img_res, 1.0 / scale_factor)

        imgt_pred = multi_flow_combine(self.comb_block, img0, img1, up_flow0_1,
                                       up_flow1_1, mask, img_res, mean_)
        imgt_pred = jnp.clip(imgt_pred, 0.0, 1.0)

        # internal NHWC -> external NCHW
        imgt_pred_out = jnp.transpose(imgt_pred, (0, 3, 1, 2))
        if eval:
            return {'imgt_pred': imgt_pred_out}

        def nchw(t):
            return jnp.transpose(t, (0, 3, 1, 2))

        def multi_nchw(t, n):   # (b,h,w,2n) -> (b,n,2,h,w)
            bb, hh, ww, _ = t.shape
            return jnp.transpose(t.reshape(bb, hh, ww, n, 2), (0, 3, 4, 1, 2))

        return {'imgt_pred': imgt_pred_out,
                'flow0_pred': [multi_nchw(up_flow0_1, self.num_flows),
                               nchw(up_flow0_2), nchw(up_flow0_3), nchw(up_flow0_4)],
                'flow1_pred': [multi_nchw(up_flow1_1, self.num_flows),
                               nchw(up_flow1_2), nchw(up_flow1_3), nchw(up_flow1_4)],
                'ft_pred': [nchw(ft_1_), nchw(ft_2_), nchw(ft_3_)]}


# -----------------------------------------------------------------------------
if __name__ == "__main__":
    key = jax.random.PRNGKey(0)
    k0, k1 = jax.random.split(key)
    # Smallest spatial size where all 4 correlation-pyramid levels pool cleanly:
    # H, W divisible by 64.
    B, H, W = 1, 64, 64
    img0 = jax.random.uniform(k0, (B, 3, H, W), jnp.float32)
    img1 = jax.random.uniform(k1, (B, 3, H, W), jnp.float32)
    embt = jnp.full((B, 1, 1, 1), 0.5, jnp.float32)

    model = Model()
    out = model.forward(img0, img1, embt, scale_factor=1.0, eval=False)
    imgt = jax.block_until_ready(out['imgt_pred'])

    assert imgt.shape == (B, 3, H, W), imgt.shape
    assert out['flow0_pred'][0].shape == (B, 5, 2, H, W)
    assert out['ft_pred'][0].shape == (B, 84, H // 2, W // 2)
    assert bool(jnp.isfinite(imgt).all())
    print("KERNEL_OK")
</pallas_src>

<mosaic_0001>
module attributes {stable_mosaic.version = 11 : i64} {
  func.func @_mm_fused_kernel(%arg0: i32, %arg1: memref<1024x147xbf16, #tpu.memory_space<vmem>>, %arg2: memref<147x64xbf16, #tpu.memory_space<vmem>>, %arg3: memref<1x64xf32, #tpu.memory_space<vmem>>, %arg4: memref<1x64xf32, #tpu.memory_space<vmem>>, %arg5: memref<1024x64xf32, #tpu.memory_space<vmem>>) attributes {dimension_semantics = [#tpu.dimension_semantics<parallel>], iteration_bounds = array<i64: 2>, scalar_prefetch = 0 : i64, scratch_operands = 0 : i64, tpu.core_type = #tpu.core_type<tc>, window_params = [{transform_indices = @transform_0, window_bounds = array<i64: 1024, 147>}, {pipeline_mode = #tpu.pipeline_mode<synchronous>, transform_indices = @transform_1, window_bounds = array<i64: 147, 64>}, {pipeline_mode = #tpu.pipeline_mode<synchronous>, transform_indices = @transform_2, window_bounds = array<i64: 1, 64>}, {pipeline_mode = #tpu.pipeline_mode<synchronous>, transform_indices = @transform_3, window_bounds = array<i64: 1, 64>}, {transform_indices = @transform_4, window_bounds = array<i64: 1024, 64>}]} {
    %c0 = arith.constant 0 : index
    %c0_0 = arith.constant 0 : index
    %0 = vector.load %arg1[%c0, %c0_0] : memref<1024x147xbf16, #tpu.memory_space<vmem>>, vector<1024x147xbf16>
    %c0_1 = arith.constant 0 : index
    %c0_2 = arith.constant 0 : index
    %1 = vector.load %arg2[%c0_1, %c0_2] : memref<147x64xbf16, #tpu.memory_space<vmem>>, vector<147x64xbf16>
    %cst = arith.constant dense<0.000000e+00> : vector<1024x64xf32>
    %2 = tpu.matmul %0, %1, %cst {dimension_numbers = #tpu.dot_dimension_numbers<[1], [0], [0], [1], [0, 0, 1, 1], [], []>} : vector<1024x147xbf16>, vector<147x64xbf16>, vector<1024x64xf32> -> vector<1024x64xf32>
    %c0_3 = arith.constant 0 : index
    %c0_4 = arith.constant 0 : index
    %3 = vector.load %arg3[%c0_3, %c0_4] : memref<1x64xf32, #tpu.memory_space<vmem>>, vector<1x64xf32>
    %4 = vector.broadcast %3 : vector<1x64xf32> to vector<1024x64xf32>
    %5 = arith.addf %2, %4 : vector<1024x64xf32>
    %c0_5 = arith.constant 0 : index
    %c0_6 = arith.constant 0 : index
    %6 = vector.load %arg4[%c0_5, %c0_6] : memref<1x64xf32, #tpu.memory_space<vmem>>, vector<1x64xf32>
    %cst_7 = arith.constant 0.000000e+00 : f32
    %7 = vector.broadcast %cst_7 : f32 to vector<1024x64xf32>
    %8 = arith.cmpf oge, %5, %7 : vector<1024x64xf32>
    %9 = vector.broadcast %6 : vector<1x64xf32> to vector<1024x64xf32>
    %10 = arith.mulf %9, %5 : vector<1024x64xf32>
    %11 = arith.select %8, %5, %10 : vector<1024x64xi1>, vector<1024x64xf32>
    %c0_8 = arith.constant 0 : index
    %c0_9 = arith.constant 0 : index
    %12 = vector.load %arg5[%c0_8, %c0_9] : memref<1024x64xf32, #tpu.memory_space<vmem>>, vector<1024x64xf32>
    tpu.vector_store %arg5[%c0_8, %c0_9], %11 {strides = array<i32>} : memref<1024x64xf32, #tpu.memory_space<vmem>>, vector<1024x64xf32>,
    return
  }
  func.func @transform_0(%arg0: i32) -> (i32, i32) {
    %c0_i32 = arith.constant 0 : i32
    %c0_i32_0 = arith.constant 0 : i32
    return %arg0, %c0_i32 : i32, i32
  }
  func.func @transform_1(%arg0: i32) -> (i32, i32) {
    %c0_i32 = arith.constant 0 : i32
    %c0_i32_0 = arith.constant 0 : i32
    %c0_i32_1 = arith.constant 0 : i32
    return %c0_i32, %c0_i32_0 : i32, i32
  }
  func.func @transform_2(%arg0: i32) -> (i32, i32) {
    %c0_i32 = arith.constant 0 : i32
    %c0_i32_0 = arith.constant 0 : i32
    %c0_i32_1 = arith.constant 0 : i32
    return %c0_i32, %c0_i32_0 : i32, i32
  }
  func.func @transform_3(%arg0: i32) -> (i32, i32) {
    %c0_i32 = arith.constant 0 : i32
    %c0_i32_0 = arith.constant 0 : i32
    %c0_i32_1 = arith.constant 0 : i32
    return %c0_i32, %c0_i32_0 : i32, i32
  }
  func.func @transform_4(%arg0: i32) -> (i32, i32) {
    %c0_i32 = arith.constant 0 : i32
    %c0_i32_0 = arith.constant 0 : i32
    return %arg0, %c0_i32 : i32, i32
  }
}

</mosaic_0001>

<bundles_post_ra>
// kernel: conv2d_pallas.1
= control target key start
LH: loop header
LB: loop body
LE: loop exit
PB: predicated region body
PF: predicated region fallthrough
CT: control target
= control target key end

     0   :  { %9 = vsyncpa [#allocation3], 0  ;;  %s3776_s0 = inlined_call_operand.vmem [shape: bf16[2048,147], index: 0, kind: input, shape index: {}]   ;;  %s3777_s1 = inlined_call_operand.vmem [shape: bf16[147,64], index: 1, kind: input, shape index: {}]   ;;  %s3778_s2 = inlined_call_operand.vmem [shape: f32[1,64], index: 2, kind: input, shape index: {}]   ;;  %s3779_s3 = inlined_call_operand.vmem [shape: f32[1,64], index: 3, kind: input, shape index: {}]   ;;  %s3780_s4 = inlined_call_operand.hbm [shape: f32[2048,64], index: 4, kind: output, shape index: {}]  }
   0x1   :  { %11 = vsyncpa [#allocation3 + $0x1], 0  ;;  %s2893_s15 = smov 0   ;;  %s2895_s16 = smov 0  }
   0x2   :  { %s2897_s17 = smov 0   ;;  %s2899_s18 = smov 0  }
   0x3 LB: > { %s2914_s19 = sadd.s32 4294967295, %s2861_s18   ;;  %s2331_s20 = sadd.s32 4294967294, %s2861_s18   ;;  %s2861_s18 = sphi %s2899_s18, %s3786_s18   ;;  %s2857_s17 = sphi %s2897_s17, %s3785_s17   ;;  %s2853_s16 = sphi %s2895_s16, %s3784_s16   ;;  %s2849_s15 = sphi %s2893_s15, %s3783_s15  }
   0x4   : > { %s2918_s21 = sadd.s32 1, %s2861_s18   ;;  %s113_s22 = sadd.s32 1, %s2857_s17 }
   0x5   : > { %s110_s23 = ssub.s32 %s2861_s18, %s2918_s21  ;;  %p123_p0 = scmp.ne.s32.totalorder %s2857_s17, %s2853_s16 }
   0x6   : > { %p111_p1 = scmp.eq.s32.totalorder %s110_s23, 0  ;;  %p124_p2 = scmp.eq.s32.totalorder %s2914_s19, 1 }
   0x7   : > { %p129_p3 = scmp.ne.s32.totalorder %s2853_s16, %s2849_s15  ;;  %p130_p4 = scmp.eq.s32.totalorder %s2331_s20, 1 }
   0x8   : > { %s2929_s24 = scalar_select %p111_p1, %s2857_s17, %s113_s22  }
   0x9   : > { %p2931_p5 = por %p124_p2, %p123_p0  ;;  %p2935_p6 = por %p130_p4, %p129_p3 }
   0xa   : > { %p2334_p7 = scmp.ge.s32.totalorder %s2861_s18, 1  ;;  %p167_p8 = scmp.lt.s32.totalorder %s2861_s18, 3 }
   0xc   : > { %p168_p9 = pnand %p2334_p7, %p167_p8 }
   0xd   : > { %s2336_s7 = sshll.u32 (!%p168_p9), %s2914_s19, 7  ;;  %s191_s9 = sand.u32 (!%p168_p9), 1, %s2853_s16  }
   0xe   : > { %171 = sbr.rel (%p168_p9) target bundleno = 524 (0x20c), region = 36  ;;  %p195_p10 = scmp.lt.s32.totalorder (!%p168_p9), %s2336_s7, 255 }
   0xf   : > { %s3139_s12 = sshll.u32 (!%p168_p9), %s191_s9, 10  ;;  %s2549_s29 = sshll.u32 (!%p168_p9), %s2914_s19, 14 }
  0x10   : > { %s3160_s22 = scalar_lea.vmem (!%p168_p9), [#allocation2], %s3139_s12  ;;  %s3726_s6 = scalar_lea.hbm (!%p168_p9), %s3780_s4, %s2549_s29 }
  0x11   : > { %s2269_s30 = sshll.u32 (!%p168_p9), %s3160_s22, 4  ;;  %s3728_s30 = int_to_ptr.vmem [resolvable:$true] %s2269_s30 }
  0x12   : > { %s2801_s8 = scalar_lea.vmem (!%p168_p9), %s3728_s30, 16384 }
  0x13   : > { %v2613_v0 = vld [vmem:[%s3777_s1 + $0x38] sm:$0xff]   ;;  %v2863_v1 = vmov 0   ;;  %v2614_v2 = vld [vmem:[%s3777_s1 + $0x30] sm:$0xff]   ;;  %v2615_v3 = vld [vmem:[%s3777_s1 + $0x28] sm:$0xff]   ;;  %s3788_s7 = smov (!%p195_p10, %s2336_s7), 255  ;;  %vm990_vm0 = vcmask 154624   ;;  %p2802_p11 = scmp.ne.s32.totalorder %s3728_s30, %s2801_s8 }
  0x14   : > { %1190 = vmatprep.subr.bf16.mxu0 %v2863_v1  ;;  %2550 = vmatprep.subr.bf16.mxu1 %v2863_v1  ;;  %v2616_v4 = vld [vmem:[%s3777_s1 + $0x20] sm:$0xff]   ;;  %s2548_s10 = sshll.u32 %s3788_s7, 3  ;;  %v2617_v5 = vld [vmem:[%s3777_s1 + $0x18] sm:$0xff]   ;;  %v2618_v8 = vld [vmem:[%s3777_s1 + $0x10] sm:$0xff]   ;;  %vm1183_vm1 = vcmask 1040384   ;;  %vm1184_vm2 = vcmask 1041408  }
  0x15   : > { %1191 = vmatpush1.bf16.msra.mxu0 %v2613_v0  ;;  %2560 = vmatpush1.bf16.msra.mxu1 %v2613_v0  ;;  %s2957_s13 = scalar_lea.vmem %s3776_s0, %s2548_s10  ;;  %v2619_v9 = vld [vmem:[%s3777_s1 + $0x8] sm:$0xff]   ;;  %v2864_v10 = vmov 65535   ;;  %v2620_v12 = vld [vmem:[%s3777_s1] sm:$0xff]   ;;  %vm2126_vm3 = vcmask 523264   ;;  %s3736_s7 = scalar_lea.sflag [#allocation3], %s191_s9 }
  0x16   : > { %1192 = vmatprep.subr.bf16.mxu0 %v2863_v1  ;;  %2551 = vmatprep.subr.bf16.mxu1 %v2863_v1  ;;  %v2625_v6 = vld [vmem:[%s2957_s13 + $0x4] ss:$8 sps:$4 sm:$0xff]   ;;  %v1185_v11 = vsel %vm1183_vm1, 4294967295, %v2864_v10  ;;  %v2621_v13 = vld [vmem:[%s3777_s1 + $0x48] ss:$0 sps:$4 sm:$0x33]   ;;  %p2803_p12 = pnand %p2802_p11, %p2931_p5 }
  0x17   : > { %v2628_v7 = vld [vmem:[%s2957_s13 + $0x204] ss:$8 sps:$4 sm:$0xff]   ;;  %2478 = vmatprep.mubr.msk.bf16.mxu0 %vm990_vm0, %v2625_v6  ;;  %v1186_v14 = vsel %vm1184_vm2, %v1185_v11, 0  ;;  %v2623_v17 = vld [vmem:[%s2957_s13] ss:$8 sps:$4 sm:$0xff]   ;;  %s2865_s10 = smov [#allocation2]  }
  0x18   : > { %2510 = vmatprep.mubr.msk.bf16.mxu1 %vm990_vm0, %v2628_v7  ;;  %v1188_v15 = vand.u32 %v2621_v13, %v1186_v14  ;;  %v2622_v16 = vld [vmem:[%s3777_s1 + $0x40] sm:$0xff]   ;;  %v2629_v19 = vld [vmem:[%s2957_s13 + $0x14] ss:$8 sps:$4 sm:$0xff]   ;;  %v2633_v21 = vld [vmem:[%s2957_s13 + $0x10] ss:$8 sps:$4 sm:$0xff]   ;;  %p2804_p13 = pneg %p2803_p12  ;;  %s2805_s11 = sshll.u32 %s2865_s10, 4  ;;  %s2806_s11 = int_to_ptr.vmem [resolvable:$false] %s2805_s11 }
  0x19   : > { %1193 = vmatpush1.bf16.msra.mxu0 %v2614_v2  ;;  %2561 = vmatpush1.bf16.msra.mxu1 %v2614_v2  ;;  %v2626_v18 = vld [vmem:[%s2957_s13 + $0x200] ss:$8 sps:$4 sm:$0xff]   ;;  %v2631_v20 = vld [vmem:[%s2957_s13 + $0x214] ss:$8 sps:$4 sm:$0xff]   ;;  %v2634_v22 = vld [vmem:[%s2957_s13 + $0x210] ss:$8 sps:$4 sm:$0xff]   ;;  %p2808_p0 = scmp.lt.s32.totalorder %s3728_s30, %s2806_s11 }
  0x1a   : > { %1194 = vmatprep.subr.bf16.mxu0 %v2863_v1  ;;  %2552 = vmatprep.subr.bf16.mxu1 %v2863_v1  ;;  %v2635_v23 = vld [vmem:[%s2957_s13 + $0x24] ss:$8 sps:$4 sm:$0xff]   ;;  %v2639_v25 = vld [vmem:[%s2957_s13 + $0x20] ss:$8 sps:$4 sm:$0xff]   ;;  %v2641_v27 = vld [vmem:[%s2957_s13 + $0x34] ss:$8 sps:$4 sm:$0xff]  }
  0x1b   : > { %v2637_v24 = vld [vmem:[%s2957_s13 + $0x224] ss:$8 sps:$4 sm:$0xff]   ;;  %v2640_v26 = vld [vmem:[%s2957_s13 + $0x220] ss:$8 sps:$4 sm:$0xff]   ;;  %v2643_v28 = vld [vmem:[%s2957_s13 + $0x234] ss:$8 sps:$4 sm:$0xff]  }
  0x1c   : > { %v2645_v29 = vld [vmem:[%s2957_s13 + $0x30] ss:$8 sps:$4 sm:$0xff]   ;;  %v2647_v31 = vld [vmem:[%s2957_s13 + $0x44] ss:$8 sps:$4 sm:$0xff]   ;;  %v2651_v33 = vld [vmem:[%s2957_s13 + $0x40] ss:$8 sps:$4 sm:$0xff]  }
  0x1d   : > { %1195 = vmatpush1.bf16.msra.mxu0 %v2615_v3  ;;  %2562 = vmatpush1.bf16.msra.mxu1 %v2615_v3  ;;  %v2646_v30 = vld [vmem:[%s2957_s13 + $0x230] ss:$8 sps:$4 sm:$0xff]   ;;  %v2649_v32 = vld [vmem:[%s2957_s13 + $0x244] ss:$8 sps:$4 sm:$0xff]   ;;  %v2652_v34 = vld [vmem:[%s2957_s13 + $0x240] ss:$8 sps:$4 sm:$0xff]  }
  0x1e   : > { %1196 = vmatprep.subr.bf16.mxu0 %v2863_v1  ;;  %2553 = vmatprep.subr.bf16.mxu1 %v2863_v1  ;;  %v2653_v35 = vld [vmem:[%s2957_s13 + $0x54] ss:$8 sps:$4 sm:$0xff]   ;;  %v2657_v37 = vld [vmem:[%s2957_s13 + $0x50] ss:$8 sps:$4 sm:$0xff]   ;;  %v2659_v39 = vld [vmem:[%s2957_s13 + $0x64] ss:$8 sps:$4 sm:$0xff]  }
  0x1f   : > { %v2655_v36 = vld [vmem:[%s2957_s13 + $0x254] ss:$8 sps:$4 sm:$0xff]   ;;  %v2658_v38 = vld [vmem:[%s2957_s13 + $0x250] ss:$8 sps:$4 sm:$0xff]   ;;  %v2661_v40 = vld [vmem:[%s2957_s13 + $0x264] ss:$8 sps:$4 sm:$0xff]  }
  0x20   : > { %v2663_v41 = vld [vmem:[%s2957_s13 + $0x60] ss:$8 sps:$4 sm:$0xff]   ;;  %v2665_v43 = vld [vmem:[%s2957_s13 + $0x74] ss:$8 sps:$4 sm:$0xff]   ;;  %v2669_v45 = vld [vmem:[%s2957_s13 + $0x70] ss:$8 sps:$4 sm:$0xff]  }
  0x21   : > { %1197 = vmatpush1.bf16.msra.mxu0 %v2616_v4  ;;  %2563 = vmatpush1.bf16.msra.mxu1 %v2616_v4  ;;  %v2664_v42 = vld [vmem:[%s2957_s13 + $0x260] ss:$8 sps:$4 sm:$0xff]   ;;  %v2667_v44 = vld [vmem:[%s2957_s13 + $0x274] ss:$8 sps:$4 sm:$0xff]   ;;  %v2670_v46 = vld [vmem:[%s2957_s13 + $0x270] ss:$8 sps:$4 sm:$0xff]  }
  0x22   : > { %1198 = vmatprep.subr.bf16.mxu0 %v2863_v1  ;;  %2554 = vmatprep.subr.bf16.mxu1 %v2863_v1  ;;  %v2671_v47 = vld [vmem:[%s2957_s13 + $0x84] ss:$8 sps:$4 sm:$0xff]   ;;  %v2675_v49 = vld [vmem:[%s2957_s13 + $0x80] ss:$8 sps:$4 sm:$0xff]   ;;  %v2677_v51 = vld [vmem:[%s2957_s13 + $0x94] ss:$8 sps:$4 sm:$0xff]  }
  0x23   : > { %v2673_v48 = vld [vmem:[%s2957_s13 + $0x284] ss:$8 sps:$4 sm:$0xff]   ;;  %v2676_v50 = vld [vmem:[%s2957_s13 + $0x280] ss:$8 sps:$4 sm:$0xff]   ;;  %v2679_v52 = vld [vmem:[%s2957_s13 + $0x294] ss:$8 sps:$4 sm:$0xff]  }
  0x24   : > { %v2681_v53 = vld [vmem:[%s2957_s13 + $0x90] ss:$8 sps:$4 sm:$0xff]   ;;  %v2683_v55 = vld [vmem:[%s2957_s13 + $0xa4] ss:$8 sps:$4 sm:$0xff]   ;;  %v2687_v57 = vld [vmem:[%s2957_s13 + $0xa0] ss:$8 sps:$4 sm:$0xff]  }
  0x25   : > { %1199 = vmatpush1.bf16.msra.mxu0 %v2617_v5  ;;  %2564 = vmatpush1.bf16.msra.mxu1 %v2617_v5  ;;  %v2682_v54 = vld [vmem:[%s2957_s13 + $0x290] ss:$8 sps:$4 sm:$0xff]   ;;  %v2685_v56 = vld [vmem:[%s2957_s13 + $0x2a4] ss:$8 sps:$4 sm:$0xff]   ;;  %v2688_v58 = vld [vmem:[%s2957_s13 + $0x2a0] ss:$8 sps:$4 sm:$0xff]  }
  0x26   : > { %1200 = vmatprep.subr.bf16.mxu0 %v2863_v1  ;;  %2555 = vmatprep.subr.bf16.mxu1 %v2863_v1  ;;  %v2689_v59 = vld [vmem:[%s2957_s13 + $0xb4] ss:$8 sps:$4 sm:$0xff]   ;;  %v2693_v61 = vld [vmem:[%s2957_s13 + $0xb0] ss:$8 sps:$4 sm:$0xff]   ;;  %v2695_v63 = vld [vmem:[%s2957_s13 + $0xc4] ss:$8 sps:$4 sm:$0xff]  }
  0x27   : > { %v2691_v60 = vld [vmem:[%s2957_s13 + $0x2b4] ss:$8 sps:$4 sm:$0xff]   ;;  %v2694_v62 = vld [vmem:[%s2957_s13 + $0x2b0] ss:$8 sps:$4 sm:$0xff]   ;;  %v2697_v0 = vld [vmem:[%s2957_s13 + $0x2c4] ss:$8 sps:$4 sm:$0xff]  }
  0x28   : > { %v2700_v2 = vld [vmem:[%s2957_s13 + $0x2c0] ss:$8 sps:$4 sm:$0xff]   ;;  %v2701_v3 = vld [vmem:[%s2957_s13 + $0xd4] ss:$8 sps:$4 sm:$0xff]   ;;  %v2705_v5 = vld [vmem:[%s2957_s13 + $0xd0] ss:$8 sps:$4 sm:$0xff]  }
  0x29   : > { %1201 = vmatpush1.bf16.msra.mxu0 %v2618_v8  ;;  %2565 = vmatpush1.bf16.msra.mxu1 %v2618_v8  ;;  %v2703_v4 = vld [vmem:[%s2957_s13 + $0x2d4] ss:$8 sps:$4 sm:$0xff]   ;;  %v2706_v6 = vld [vmem:[%s2957_s13 + $0x2d0] ss:$8 sps:$4 sm:$0xff]   ;;  %v2707_v7 = vld [vmem:[%s2957_s13 + $0xe4] ss:$8 sps:$4 sm:$0xff]  }
  0x2a   : > { %1202 = vmatprep.subr.bf16.mxu0 %v2863_v1  ;;  %2556 = vmatprep.subr.bf16.mxu1 %v2863_v1  ;;  %v2709_v8 = vld [vmem:[%s2957_s13 + $0x2e4] ss:$8 sps:$4 sm:$0xff]   ;;  %v2712_v10 = vld [vmem:[%s2957_s13 + $0x2e0] ss:$8 sps:$4 sm:$0xff]   ;;  %v2713_v11 = vld [vmem:[%s2957_s13 + $0xf4] ss:$8 sps:$4 sm:$0xff]  }
  0x2b   : > { %v2717_v13 = vld [vmem:[%s2957_s13 + $0xf0] ss:$8 sps:$4 sm:$0xff]   ;;  %s2807_s12 = scalar_lea.vmem %s2806_s11, 32768 }
  0x2c   : > { %v2718_v14 = vld [vmem:[%s2957_s13 + $0x2f0] ss:$8 sps:$4 sm:$0xff]   ;;  %p2809_p1 = scmp.lt.s32.totalorder %s2807_s12, %s2801_s8 }
  0x2d   : > { %1203 = vmatpush1.bf16.msra.mxu0 %v2619_v9  ;;  %2566 = vmatpush1.bf16.msra.mxu1 %v2619_v9  ;;  %v2711_v9 = vld [vmem:[%s2957_s13 + $0xe0] ss:$8 sps:$4 sm:$0xff]  }
  0x2e   : > { %1204 = vmatprep.subr.bf16.mxu0 %v2863_v1  ;;  %2557 = vmatprep.subr.bf16.mxu1 %v2863_v1  ;;  %p2810_p2 = por %p2809_p1, %p2808_p0 }
  0x30   : > { %p2811_p3 = pnand %p2810_p2, %p2804_p13 }
  0x31   : > { %1205 = vmatpush1.bf16.msra.mxu0 %v2620_v12  ;;  %2567 = vmatpush1.bf16.msra.mxu1 %v2620_v12  ;;  %v2715_v12 = vld [vmem:[%s2957_s13 + $0x2f4] ss:$8 sps:$4 sm:$0xff]  }
  0x32   : > { %1218 = vmatprep.subr.bf16.mxu0 %v2863_v1  ;;  %2558 = vmatprep.subr.bf16.mxu1 %v2863_v1 }
  0x35   : > { %1219 = vmatpush2.bf16.msra.mxu0 %v1188_v15  ;;  %2568 = vmatpush2.bf16.msra.mxu1 %v1188_v15  ;;  %v2719_v15 = vld [vmem:[%s2957_s13 + $0x104] ss:$8 sps:$4 sm:$0xff]  }
  0x36   : > { %1220 = vmatprep.subr.bf16.mxu0 %v2863_v1  ;;  %2559 = vmatprep.subr.bf16.mxu1 %v2863_v1  ;;  %v2699_v1 = vld [vmem:[%s2957_s13 + $0xc0] ss:$8 sps:$4 sm:$0xff]  }
  0x39   : > { %1221 = vmatpush2.bf16.msra.mxu0 %v2622_v16  ;;  %2569 = vmatpush2.bf16.msra.mxu1 %v2622_v16  ;;  %v2721_v16 = vld [vmem:[%s2957_s13 + $0x304] ss:$8 sps:$4 sm:$0xff]  }
  0x3c   : > { %1223 = vmatmul.mubr.bf16.vlgmr.msra.gmra.mxu0 %v2623_v17  ;;  %1479 = vmatmul.mubr.bf16.vlgmr.msra.gmra.mxu1 %v2626_v18  ;;  %v2723_v17 = vld [vmem:[%s2957_s13 + $0x100] ss:$8 sps:$4 sm:$0xff]  }
  0x3d   : > { %2479 = vmatprep.mubr.msk.bf16.mxu0 %vm990_vm0, %v2629_v19  ;;  %2511 = vmatprep.mubr.msk.bf16.mxu1 %vm990_vm0, %v2631_v20  ;;  %v2724_v18 = vld [vmem:[%s2957_s13 + $0x300] ss:$8 sps:$4 sm:$0xff]   ;;  %v2725_v19 = vld [vmem:[%s2957_s13 + $0x114] ss:$8 sps:$4 sm:$0xff]  }
  0x3e   : > { %v2727_v20 = vld [vmem:[%s2957_s13 + $0x314] ss:$8 sps:$4 sm:$0xff]  }
  0x44   : > { %1231 = vmatmul.mubr.bf16.gmra.mxu0 %v2633_v21  ;;  %1487 = vmatmul.mubr.bf16.gmra.mxu1 %v2634_v22  ;;  %v2729_v21 = vld [vmem:[%s2957_s13 + $0x110] ss:$8 sps:$4 sm:$0xff]  }
  0x45   : > { %2480 = vmatprep.mubr.msk.bf16.mxu0 %vm990_vm0, %v2635_v23  ;;  %2512 = vmatprep.mubr.msk.bf16.mxu1 %vm990_vm0, %v2637_v24  ;;  %v2730_v22 = vld [vmem:[%s2957_s13 + $0x310] ss:$8 sps:$4 sm:$0xff]   ;;  %v2731_v23 = vld [vmem:[%s2957_s13 + $0x124] ss:$8 sps:$4 sm:$0xff]  }
  0x46   : > { %v2733_v24 = vld [vmem:[%s2957_s13 + $0x324] ss:$8 sps:$4 sm:$0xff]  }
  0x4c   : > { %1239 = vmatmul.mubr.bf16.gmra.mxu0 %v2639_v25  ;;  %1495 = vmatmul.mubr.bf16.gmra.mxu1 %v2640_v26  ;;  %v2735_v25 = vld [vmem:[%s2957_s13 + $0x120] ss:$8 sps:$4 sm:$0xff]  }
  0x4d   : > { %2481 = vmatprep.mubr.msk.bf16.mxu0 %vm990_vm0, %v2641_v27  ;;  %2513 = vmatprep.mubr.msk.bf16.mxu1 %vm990_vm0, %v2643_v28  ;;  %v2736_v26 = vld [vmem:[%s2957_s13 + $0x320] ss:$8 sps:$4 sm:$0xff]   ;;  %v2737_v27 = vld [vmem:[%s2957_s13 + $0x134] ss:$8 sps:$4 sm:$0xff]  }
  0x4e   : > { %v2739_v28 = vld [vmem:[%s2957_s13 + $0x334] ss:$8 sps:$4 sm:$0xff]  }
  0x54   : > { %1247 = vmatmul.mubr.bf16.gmra.mxu0 %v2645_v29  ;;  %1503 = vmatmul.mubr.bf16.gmra.mxu1 %v2646_v30  ;;  %v2741_v29 = vld [vmem:[%s2957_s13 + $0x130] ss:$8 sps:$4 sm:$0xff]  }
  0x55   : > { %2482 = vmatprep.mubr.msk.bf16.mxu0 %vm990_vm0, %v2647_v31  ;;  %2514 = vmatprep.mubr.msk.bf16.mxu1 %vm990_vm0, %v2649_v32  ;;  %v2742_v30 = vld [vmem:[%s2957_s13 + $0x330] ss:$8 sps:$4 sm:$0xff]   ;;  %v2743_v31 = vld [vmem:[%s2957_s13 + $0x144] ss:$8 sps:$4 sm:$0xff]  }
  0x56   : > { %v2745_v32 = vld [vmem:[%s2957_s13 + $0x344] ss:$8 sps:$4 sm:$0xff]  }
  0x5c   : > { %1255 = vmatmul.mubr.bf16.gmra.mxu0 %v2651_v33  ;;  %1511 = vmatmul.mubr.bf16.gmra.mxu1 %v2652_v34  ;;  %v2747_v33 = vld [vmem:[%s2957_s13 + $0x140] ss:$8 sps:$4 sm:$0xff]  }
  0x5d   : > { %2483 = vmatprep.mubr.msk.bf16.mxu0 %vm990_vm0, %v2653_v35  ;;  %2515 = vmatprep.mubr.msk.bf16.mxu1 %vm990_vm0, %v2655_v36  ;;  %v2748_v34 = vld [vmem:[%s2957_s13 + $0x340] ss:$8 sps:$4 sm:$0xff]   ;;  %v2749_v35 = vld [vmem:[%s2957_s13 + $0x154] ss:$8 sps:$4 sm:$0xff]  }
  0x5e   : > { %v2751_v36 = vld [vmem:[%s2957_s13 + $0x354] ss:$8 sps:$4 sm:$0xff]  }
  0x64   : > { %1263 = vmatmul.mubr.bf16.gmra.mxu0 %v2657_v37  ;;  %1519 = vmatmul.mubr.bf16.gmra.mxu1 %v2658_v38  ;;  %v2753_v37 = vld [vmem:[%s2957_s13 + $0x150] ss:$8 sps:$4 sm:$0xff]  }
  0x65   : > { %2484 = vmatprep.mubr.msk.bf16.mxu0 %vm990_vm0, %v2659_v39  ;;  %2516 = vmatprep.mubr.msk.bf16.mxu1 %vm990_vm0, %v2661_v40  ;;  %v2754_v38 = vld [vmem:[%s2957_s13 + $0x350] ss:$8 sps:$4 sm:$0xff]   ;;  %v2755_v39 = vld [vmem:[%s2957_s13 + $0x164] ss:$8 sps:$4 sm:$0xff]  }
  0x66   : > { %v2757_v40 = vld [vmem:[%s2957_s13 + $0x364] ss:$8 sps:$4 sm:$0xff]  }
  0x6c   : > { %1271 = vmatmul.mubr.bf16.gmra.mxu0 %v2663_v41  ;;  %1527 = vmatmul.mubr.bf16.gmra.mxu1 %v2664_v42  ;;  %v2759_v41 = vld [vmem:[%s2957_s13 + $0x160] ss:$8 sps:$4 sm:$0xff]  }
  0x6d   : > { %2485 = vmatprep.mubr.msk.bf16.mxu0 %vm990_vm0, %v2665_v43  ;;  %2517 = vmatprep.mubr.msk.bf16.mxu1 %vm990_vm0, %v2667_v44  ;;  %v2760_v42 = vld [vmem:[%s2957_s13 + $0x360] ss:$8 sps:$4 sm:$0xff]   ;;  %v2761_v43 = vld [vmem:[%s2957_s13 + $0x174] ss:$8 sps:$4 sm:$0xff]  }
  0x6e   : > { %v2763_v44 = vld [vmem:[%s2957_s13 + $0x374] ss:$8 sps:$4 sm:$0xff]  }
  0x74   : > { %1279 = vmatmul.mubr.bf16.gmra.mxu0 %v2669_v45  ;;  %1535 = vmatmul.mubr.bf16.gmra.mxu1 %v2670_v46  ;;  %v2765_v45 = vld [vmem:[%s2957_s13 + $0x170] ss:$8 sps:$4 sm:$0xff]  }
  0x75   : > { %2486 = vmatprep.mubr.msk.bf16.mxu0 %vm990_vm0, %v2671_v47  ;;  %2518 = vmatprep.mubr.msk.bf16.mxu1 %vm990_vm0, %v2673_v48  ;;  %v2766_v46 = vld [vmem:[%s2957_s13 + $0x370] ss:$8 sps:$4 sm:$0xff]   ;;  %v2767_v47 = vld [vmem:[%s2957_s13 + $0x184] ss:$8 sps:$4 sm:$0xff]  }
  0x76   : > { %v2769_v48 = vld [vmem:[%s2957_s13 + $0x384] ss:$8 sps:$4 sm:$0xff]  }
  0x7c   : > { %1287 = vmatmul.mubr.bf16.gmra.mxu0 %v2675_v49  ;;  %1543 = vmatmul.mubr.bf16.gmra.mxu1 %v2676_v50  ;;  %v251_v49 = vld [vmem:[%s2957_s13 + $0x180] sm:$0xff]  ;;  %v252_v50 = vld [vmem:[%s2957_s13 + $0x188] sm:$0xff] }
  0x7d   : > { %2487 = vmatprep.mubr.msk.bf16.mxu0 %vm990_vm0, %v2677_v51  ;;  %2519 = vmatprep.mubr.msk.bf16.mxu1 %vm990_vm0, %v2679_v52  ;;  %v315_v51 = vld [vmem:[%s2957_s13 + $0x380] sm:$0xff]  ;;  %v316_v52 = vld [vmem:[%s2957_s13 + $0x388] sm:$0xff] }
  0x84   : > { %1295 = vmatmul.mubr.bf16.gmra.mxu0 %v2681_v53  ;;  %1551 = vmatmul.mubr.bf16.gmra.mxu1 %v2682_v54  ;;  %v2388_v53 = vcombine.low %v251_v49, %v252_v50  ;;  %v2452_v54 = vcombine.low %v315_v51, %v316_v52  ;;  %v257_v51 = vld [vmem:[%s2957_s13 + $0x1b0] sm:$0xff] }
  0x85   : > { %2488 = vmatprep.mubr.msk.bf16.mxu0 %vm990_vm0, %v2683_v55  ;;  %2520 = vmatprep.mubr.msk.bf16.mxu1 %vm990_vm0, %v2685_v56  ;;  %v2771_v55 = vld [vmem:[%s2957_s13 + $0x194] ss:$8 sps:$4 sm:$0xff]  }
  0x86   : > { %v2773_v56 = vld [vmem:[%s2957_s13 + $0x394] ss:$8 sps:$4 sm:$0xff]  }
  0x8c   : > { %1303 = vmatmul.mubr.bf16.gmra.mxu0 %v2687_v57  ;;  %1559 = vmatmul.mubr.bf16.gmra.mxu1 %v2688_v58  ;;  %v3135_v57 = vld [vmem:[%s3778_s2] ss:$0 sm:$0xff] }
  0x8d   : > { %2489 = vmatprep.mubr.msk.bf16.mxu0 %vm990_vm0, %v2689_v59  ;;  %2521 = vmatprep.mubr.msk.bf16.mxu1 %vm990_vm0, %v2691_v60  ;;  %v3144_v59 = vld [vmem:[%s3779_s3] ss:$0 sm:$0xff] }
  0x94   : > { %1311 = vmatmul.mubr.bf16.gmra.mxu0 %v2693_v61  ;;  %1567 = vmatmul.mubr.bf16.gmra.mxu1 %v2694_v62  ;;  %v253_v61 = vld [vmem:[%s2957_s13 + $0x190] sm:$0xff] }
  0x95   : > { %2490 = vmatprep.mubr.msk.bf16.mxu0 %vm990_vm0, %v2695_v63  ;;  %2522 = vmatprep.mubr.msk.bf16.mxu1 %vm990_vm0, %v2697_v0  ;;  %v254_v0 = vld [vmem:[%s2957_s13 + $0x198] sm:$0xff] }
  0x9c   : > { %1319 = vmatmul.mubr.bf16.gmra.mxu0 %v2699_v1  ;;  %1575 = vmatmul.mubr.bf16.gmra.mxu1 %v2700_v2  ;;  %v317_v1 = vld [vmem:[%s2957_s13 + $0x390] sm:$0xff]  ;;  %v318_v2 = vld [vmem:[%s2957_s13 + $0x398] sm:$0xff] }
  0x9d   : > { %2491 = vmatprep.mubr.msk.bf16.mxu0 %vm990_vm0, %v2701_v3  ;;  %2523 = vmatprep.mubr.msk.bf16.mxu1 %vm990_vm0, %v2703_v4 }
  0xa4   : > { %1327 = vmatmul.mubr.bf16.gmra.mxu0 %v2705_v5  ;;  %1583 = vmatmul.mubr.bf16.gmra.mxu1 %v2706_v6 }
  0xa5   : > { %2492 = vmatprep.mubr.msk.bf16.mxu0 %vm990_vm0, %v2707_v7  ;;  %2524 = vmatprep.mubr.msk.bf16.mxu1 %vm990_vm0, %v2709_v8 }
  0xac   : > { %1335 = vmatmul.mubr.bf16.gmra.mxu0 %v2711_v9  ;;  %1591 = vmatmul.mubr.bf16.gmra.mxu1 %v2712_v10  ;;  %v2390_v9 = vcombine.low %v253_v61, %v254_v0  ;;  %v2454_v10 = vcombine.low %v317_v1, %v318_v2 }
  0xad   : > { %2493 = vmatprep.mubr.msk.bf16.mxu0 %vm990_vm0, %v2713_v11  ;;  %2525 = vmatprep.mubr.msk.bf16.mxu1 %vm990_vm0, %v2715_v12 }
  0xb4   : > { %1343 = vmatmul.mubr.bf16.gmra.mxu0 %v2717_v13  ;;  %1599 = vmatmul.mubr.bf16.gmra.mxu1 %v2718_v14 }
  0xb5   : > { %2494 = vmatprep.mubr.msk.bf16.mxu0 %vm990_vm0, %v2719_v15  ;;  %2526 = vmatprep.mubr.msk.bf16.mxu1 %vm990_vm0, %v2721_v16  ;;  %v2775_v15 = vld [vmem:[%s2957_s13 + $0x1a4] ss:$8 sps:$4 sm:$0xff]  }
  0xbc   : > { %1351 = vmatmul.mubr.bf16.gmra.mxu0 %v2723_v17  ;;  %1607 = vmatmul.mubr.bf16.gmra.mxu1 %v2724_v18  ;;  %v2777_v18 = vld [vmem:[%s2957_s13 + $0x3a4] ss:$8 sps:$4 sm:$0xff]  }
  0xbd   : > { %2495 = vmatprep.mubr.msk.bf16.mxu0 %vm990_vm0, %v2725_v19  ;;  %2527 = vmatprep.mubr.msk.bf16.mxu1 %vm990_vm0, %v2727_v20 }
  0xc4   : > { %1359 = vmatmul.mubr.bf16.gmra.mxu0 %v2729_v21  ;;  %1615 = vmatmul.mubr.bf16.gmra.mxu1 %v2730_v22 }
  0xc5   : > { %2496 = vmatprep.mubr.msk.bf16.mxu0 %vm990_vm0, %v2731_v23  ;;  %2528 = vmatprep.mubr.msk.bf16.mxu1 %vm990_vm0, %v2733_v24  ;;  %v255_v23 = vld [vmem:[%s2957_s13 + $0x1a0] sm:$0xff] }
  0xcc   : > { %1367 = vmatmul.mubr.bf16.gmra.mxu0 %v2735_v25  ;;  %1623 = vmatmul.mubr.bf16.gmra.mxu1 %v2736_v26 }
  0xcd   : > { %2497 = vmatprep.mubr.msk.bf16.mxu0 %vm990_vm0, %v2737_v27  ;;  %2529 = vmatprep.mubr.msk.bf16.mxu1 %vm990_vm0, %v2739_v28  ;;  %v256_v28 = vld [vmem:[%s2957_s13 + $0x1a8] sm:$0xff] }
  0xd4   : > { %1375 = vmatmul.mubr.bf16.gmra.mxu0 %v2741_v29  ;;  %1631 = vmatmul.mubr.bf16.gmra.mxu1 %v2742_v30  ;;  %v319_v29 = vld [vmem:[%s2957_s13 + $0x3a0] sm:$0xff]  ;;  %v320_v30 = vld [vmem:[%s2957_s13 + $0x3a8] sm:$0xff] }
  0xd5   : > { %2498 = vmatprep.mubr.msk.bf16.mxu0 %vm990_vm0, %v2743_v31  ;;  %2530 = vmatprep.mubr.msk.bf16.mxu1 %vm990_vm0, %v2745_v32 }
  0xdc   : > { %1383 = vmatmul.mubr.bf16.gmra.mxu0 %v2747_v33  ;;  %1639 = vmatmul.mubr.bf16.gmra.mxu1 %v2748_v34 }
  0xdd   : > { %2499 = vmatprep.mubr.msk.bf16.mxu0 %vm990_vm0, %v2749_v35  ;;  %2531 = vmatprep.mubr.msk.bf16.mxu1 %vm990_vm0, %v2751_v36 }
  0xe4   : > { %1391 = vmatmul.mubr.bf16.gmra.mxu0 %v2753_v37  ;;  %1647 = vmatmul.mubr.bf16.gmra.mxu1 %v2754_v38  ;;  %v2392_v37 = vcombine.low %v255_v23, %v256_v28  ;;  %v2456_v38 = vcombine.low %v319_v29, %v320_v30  ;;  %v323_v23 = vld [vmem:[%s2957_s13 + $0x3c0] sm:$0xff] }
  0xe5   : > { %2500 = vmatprep.mubr.msk.bf16.mxu0 %vm990_vm0, %v2755_v39  ;;  %2532 = vmatprep.mubr.msk.bf16.mxu1 %vm990_vm0, %v2757_v40 }
  0xec   : > { %1399 = vmatmul.mubr.bf16.gmra.mxu0 %v2759_v41  ;;  %1655 = vmatmul.mubr.bf16.gmra.mxu1 %v2760_v42 }
  0xed   : > { %2501 = vmatprep.mubr.msk.bf16.mxu0 %vm990_vm0, %v2761_v43  ;;  %2533 = vmatprep.mubr.msk.bf16.mxu1 %vm990_vm0, %v2763_v44  ;;  %v2779_v43 = vld [vmem:[%s2957_s13 + $0x1b4] ss:$8 sps:$4 sm:$0xff]  }
  0xf4   : > { %1407 = vmatmul.mubr.bf16.gmra.mxu0 %v2765_v45  ;;  %1663 = vmatmul.mubr.bf16.gmra.mxu1 %v2766_v46  ;;  %v2781_v46 = vld [vmem:[%s2957_s13 + $0x3b4] ss:$8 sps:$4 sm:$0xff]  }
  0xf5   : > { %2502 = vmatprep.mubr.msk.bf16.mxu0 %vm990_vm0, %v2767_v47  ;;  %2534 = vmatprep.mubr.msk.bf16.mxu1 %vm990_vm0, %v2769_v48 }
  0xfc   : > { %v1224_v58 = vpop.f32.mrf.mxu0  ;;  %1415 = vmatmul.mubr.bf16.gmra.mxu0 %v2388_v53  ;;  %v1480_v60 = vpop.f32.mrf.mxu1  ;;  %1671 = vmatmul.mubr.bf16.gmra.mxu1 %v2452_v54 }
  0xfd   : > { %v1225_v62 = vadd.f32 %v3135_v57, %v1224_v58  ;;  %v1481_v63 = vadd.f32 %v3135_v57, %v1480_v60  ;;  %2503 = vmatprep.mubr.msk.bf16.mxu0 %vm990_vm0, %v2771_v55  ;;  %2535 = vmatprep.mubr.msk.bf16.mxu1 %vm990_vm0, %v2773_v56  ;;  %v258_v56 = vld [vmem:[%s2957_s13 + $0x1b8] sm:$0xff]  ;;  %v321_v58 = vld [vmem:[%s2957_s13 + $0x3b0] sm:$0xff] }
  0xfe   : > { %v1226_v3 = vpop.f32.mrf.mxu0  ;;  %v1482_v4 = vpop.f32.mrf.mxu1  ;;  %v322_v60 = vld [vmem:[%s2957_s13 + $0x3b8] sm:$0xff] }
  0xff   : > { %vm1736_vm4 = vcmp.ge.f32.partialorder %v1225_v62, 0.0  ;;  %v1870_v5 = vmul.f32 %v3144_v59, %v1225_v62  ;;  %vm1800_vm5 = vcmp.ge.f32.partialorder %v1481_v63, 0.0  ;;  %v1934_v6 = vmul.f32 %v3144_v59, %v1481_v63 }
 0x100   : > { %v1227_v7 = vpop.f32.mrf.mxu0  ;;  %v1483_v8 = vpop.f32.mrf.mxu1  ;;  %v2394_v3 = vcombine.low %v257_v51, %v258_v56  ;;  %v2458_v4 = vcombine.low %v321_v58, %v322_v60  ;;  %v325_v51 = vld [vmem:[%s2957_s13 + $0x3d0] sm:$0xff] }
 0x101   : > { %v1998_v11 = vsel %vm1736_vm4, %v1225_v62, %v1870_v5  ;;  %v2062_v12 = vsel %vm1800_vm5, %v1481_v63, %v1934_v6  ;;  %v1228_v13 = vadd.f32 %v3135_v57, %v1227_v7  ;;  %v1484_v14 = vadd.f32 %v3135_v57, %v1483_v8 }
 0x102   : > { %2127 = vst.msk [vmem:[%s3160_s22] sm:$0xff] %vm2126_vm3, %v1998_v11  ;;  %2191 = vst.msk [vmem:[%s3160_s22 + $0x200] sm:$0xff] %vm2126_vm3, %v2062_v12  ;;  %v1229_v16 = vpop.f32.mrf.mxu0  ;;  %v1485_v17 = vpop.f32.mrf.mxu1  ;;  %v2785_v12 = vld [vmem:[%s2957_s13 + $0x3c4] ss:$8 sps:$4 sm:$0xff]  }
 0x103   : > { %vm1737_vm6 = vcmp.ge.f32.partialorder %v1228_v13, 0.0  ;;  %v1871_v19 = vmul.f32 %v3144_v59, %v1228_v13  ;;  %vm1801_vm7 = vcmp.ge.f32.partialorder %v1484_v14, 0.0  ;;  %v1935_v20 = vmul.f32 %v3144_v59, %v1484_v14  ;;  %v259_v17 = vld [vmem:[%s2957_s13 + $0x1c0] sm:$0xff] }
 0x104   : > { %v1232_v21 = vpop.f32.mrf.mxu0  ;;  %1423 = vmatmul.mubr.bf16.gmra.mxu0 %v2390_v9  ;;  %v1488_v22 = vpop.f32.mrf.mxu1  ;;  %1679 = vmatmul.mubr.bf16.gmra.mxu1 %v2454_v10  ;;  %v2783_v9 = vld [vmem:[%s2957_s13 + $0x1c4] ss:$8 sps:$4 sm:$0xff]  }
 0x105   : > { %v1999_v24 = vsel %vm1737_vm6, %v1228_v13, %v1871_v19  ;;  %v2063_v25 = vsel %vm1801_vm7, %v1484_v14, %v1935_v20  ;;  %v1233_v26 = vadd.f32 %v3135_v57, %v1232_v21  ;;  %v1489_v27 = vadd.f32 %v3135_v57, %v1488_v22  ;;  %2504 = vmatprep.mubr.msk.bf16.mxu0 %vm990_vm0, %v2775_v15  ;;  %v260_v22 = vld [vmem:[%s2957_s13 + $0x1c8] sm:$0xff] }
 0x106   : > { %2128 = vst.msk [vmem:[%s3160_s22 + $0x8] sm:$0xff] %vm2126_vm3, %v1999_v24  ;;  %2192 = vst.msk [vmem:[%s3160_s22 + $0x208] sm:$0xff] %vm2126_vm3, %v2063_v25  ;;  %v1234_v31 = vpop.f32.mrf.mxu0  ;;  %v1490_v32 = vpop.f32.mrf.mxu1  ;;  %2536 = vmatprep.mubr.msk.bf16.mxu1 %vm990_vm0, %v2777_v18  ;;  %v324_v24 = vld [vmem:[%s2957_s13 + $0x3c8] sm:$0xff] }
 0x107   : > { %vm1738_vm8 = vcmp.ge.f32.partialorder %v1233_v26, 0.0  ;;  %v1872_v33 = vmul.f32 %v3144_v59, %v1233_v26  ;;  %vm1802_vm9 = vcmp.ge.f32.partialorder %v1489_v27, 0.0  ;;  %v1936_v34 = vmul.f32 %v3144_v59, %v1489_v27 }
 0x108   : > { %v1235_v35 = vpop.f32.mrf.mxu0  ;;  %v1491_v36 = vpop.f32.mrf.mxu1  ;;  %v2396_v31 = vcombine.low %v259_v17, %v260_v22  ;;  %v2460_v32 = vcombine.low %v323_v23, %v324_v24  ;;  %v327_v17 = vld [vmem:[%s2957_s13 + $0x3e0] sm:$0xff] }
 0x109   : > { %v2000_v39 = vsel %vm1738_vm8, %v1233_v26, %v1872_v33  ;;  %v2064_v40 = vsel %vm1802_vm9, %v1489_v27, %v1936_v34  ;;  %v1236_v41 = vadd.f32 %v3135_v57, %v1235_v35  ;;  %v1492_v42 = vadd.f32 %v3135_v57, %v1491_v36 }
 0x10a   : > { %2129 = vst.msk [vmem:[%s3160_s22 + $0x10] sm:$0xff] %vm2126_vm3, %v2000_v39  ;;  %2193 = vst.msk [vmem:[%s3160_s22 + $0x210] sm:$0xff] %vm2126_vm3, %v2064_v40  ;;  %v1237_v44 = vpop.f32.mrf.mxu0  ;;  %v1493_v45 = vpop.f32.mrf.mxu1  ;;  %v2789_v40 = vld [vmem:[%s2957_s13 + $0x3d4] ss:$8 sps:$4 sm:$0xff]  }
 0x10b   : > { %vm1739_vm10 = vcmp.ge.f32.partialorder %v1236_v41, 0.0  ;;  %v1873_v47 = vmul.f32 %v3144_v59, %v1236_v41  ;;  %vm1803_vm11 = vcmp.ge.f32.partialorder %v1492_v42, 0.0  ;;  %v1937_v48 = vmul.f32 %v3144_v59, %v1492_v42  ;;  %v261_v45 = vld [vmem:[%s2957_s13 + $0x1d0] sm:$0xff] }
 0x10c   : > { %v1240_v49 = vpop.f32.mrf.mxu0  ;;  %1431 = vmatmul.mubr.bf16.gmra.mxu0 %v2392_v37  ;;  %v1496_v50 = vpop.f32.mrf.mxu1  ;;  %1687 = vmatmul.mubr.bf16.gmra.mxu1 %v2456_v38  ;;  %v2787_v37 = vld [vmem:[%s2957_s13 + $0x1d4] ss:$8 sps:$4 sm:$0xff]  }
 0x10d   : > { %v2001_v52 = vsel %vm1739_vm10, %v1236_v41, %v1873_v47  ;;  %v2065_v53 = vsel %vm1803_vm11, %v1492_v42, %v1937_v48  ;;  %v1241_v54 = vadd.f32 %v3135_v57, %v1240_v49  ;;  %v1497_v55 = vadd.f32 %v3135_v57, %v1496_v50  ;;  %2505 = vmatprep.mubr.msk.bf16.mxu0 %vm990_vm0, %v2779_v43  ;;  %v262_v50 = vld [vmem:[%s2957_s13 + $0x1d8] sm:$0xff] }
 0x10e   : > { %2130 = vst.msk [vmem:[%s3160_s22 + $0x18] sm:$0xff] %vm2126_vm3, %v2001_v52  ;;  %2194 = vst.msk [vmem:[%s3160_s22 + $0x218] sm:$0xff] %vm2126_vm3, %v2065_v53  ;;  %v1242_v61 = vpop.f32.mrf.mxu0  ;;  %v1498_v62 = vpop.f32.mrf.mxu1  ;;  %2537 = vmatprep.mubr.msk.bf16.mxu1 %vm990_vm0, %v2781_v46  ;;  %v326_v52 = vld [vmem:[%s2957_s13 + $0x3d8] sm:$0xff] }
 0x10f   : > { %vm1740_vm12 = vcmp.ge.f32.partialorder %v1241_v54, 0.0  ;;  %v1874_v63 = vmul.f32 %v3144_v59, %v1241_v54  ;;  %vm1804_vm13 = vcmp.ge.f32.partialorder %v1497_v55, 0.0  ;;  %v1938_v0 = vmul.f32 %v3144_v59, %v1497_v55 }
 0x110   : > { %v1243_v1 = vpop.f32.mrf.mxu0  ;;  %v1499_v2 = vpop.f32.mrf.mxu1  ;;  %v2398_v61 = vcombine.low %v261_v45, %v262_v50  ;;  %v2462_v62 = vcombine.low %v325_v51, %v326_v52  ;;  %v329_v45 = vld [vmem:[%s2957_s13 + $0x3f0] sm:$0xff] }
 0x111   : > { %v2002_v5 = vsel %vm1740_vm12, %v1241_v54, %v1874_v63  ;;  %v2066_v6 = vsel %vm1804_vm13, %v1497_v55, %v1938_v0  ;;  %v1244_v7 = vadd.f32 %v3135_v57, %v1243_v1  ;;  %v1500_v8 = vadd.f32 %v3135_v57, %v1499_v2 }
 0x112   : > { %2131 = vst.msk [vmem:[%s3160_s22 + $0x20] sm:$0xff] %vm2126_vm3, %v2002_v5  ;;  %2195 = vst.msk [vmem:[%s3160_s22 + $0x220] sm:$0xff] %vm2126_vm3, %v2066_v6  ;;  %v1245_v10 = vpop.f32.mrf.mxu0  ;;  %v1501_v11 = vpop.f32.mrf.mxu1  ;;  %v2793_v6 = vld [vmem:[%s2957_s13 + $0x3e4] ss:$8 sps:$4 sm:$0xff]  }
 0x113   : > { %vm1741_vm14 = vcmp.ge.f32.partialorder %v1244_v7, 0.0  ;;  %v1875_v13 = vmul.f32 %v3144_v59, %v1244_v7  ;;  %vm1805_vm15 = vcmp.ge.f32.partialorder %v1500_v8, 0.0  ;;  %v1939_v14 = vmul.f32 %v3144_v59, %v1500_v8  ;;  %v263_v11 = vld [vmem:[%s2957_s13 + $0x1e0] sm:$0xff] }
 0x114   : > { %v1248_v15 = vpop.f32.mrf.mxu0  ;;  %1439 = vmatmul.mubr.bf16.gmra.mxu0 %v2394_v3  ;;  %v1504_v16 = vpop.f32.mrf.mxu1  ;;  %1695 = vmatmul.mubr.bf16.gmra.mxu1 %v2458_v4  ;;  %v2791_v3 = vld [vmem:[%s2957_s13 + $0x1e4] ss:$8 sps:$4 sm:$0xff]  }
 0x115   : > { %v2003_v18 = vsel %vm1741_vm14, %v1244_v7, %v1875_v13  ;;  %v2067_v19 = vsel %vm1805_vm15, %v1500_v8, %v1939_v14  ;;  %v1249_v20 = vadd.f32 %v3135_v57, %v1248_v15  ;;  %v1505_v21 = vadd.f32 %v3135_v57, %v1504_v16  ;;  %2506 = vmatprep.mubr.msk.bf16.mxu0 %vm990_vm0, %v2783_v9  ;;  %v264_v16 = vld [vmem:[%s2957_s13 + $0x1e8] sm:$0xff] }
 0x116   : > { %2132 = vst.msk [vmem:[%s3160_s22 + $0x28] sm:$0xff] %vm2126_vm3, %v2003_v18  ;;  %2196 = vst.msk [vmem:[%s3160_s22 + $0x228] sm:$0xff] %vm2126_vm3, %v2067_v19  ;;  %v1250_v25 = vpop.f32.mrf.mxu0  ;;  %v1506_v26 = vpop.f32.mrf.mxu1  ;;  %2538 = vmatprep.mubr.msk.bf16.mxu1 %vm990_vm0, %v2785_v12  ;;  %v328_v18 = vld [vmem:[%s2957_s13 + $0x3e8] sm:$0xff] }
 0x117   : > { %vm1742_vm1 = vcmp.ge.f32.partialorder %v1249_v20, 0.0  ;;  %v1876_v27 = vmul.f32 %v3144_v59, %v1249_v20  ;;  %vm1806_vm2 = vcmp.ge.f32.partialorder %v1505_v21, 0.0  ;;  %v1940_v28 = vmul.f32 %v3144_v59, %v1505_v21 }
 0x118   : > { %v1251_v29 = vpop.f32.mrf.mxu0  ;;  %v1507_v30 = vpop.f32.mrf.mxu1  ;;  %v2400_v25 = vcombine.low %v263_v11, %v264_v16  ;;  %v2464_v26 = vcombine.low %v327_v17, %v328_v18 }
 0x119   : > { %v2004_v33 = vsel %vm1742_vm1, %v1249_v20, %v1876_v27  ;;  %v2068_v34 = vsel %vm1806_vm2, %v1505_v21, %v1940_v28  ;;  %v1252_v35 = vadd.f32 %v3135_v57, %v1251_v29  ;;  %v1508_v36 = vadd.f32 %v3135_v57, %v1507_v30 }
 0x11a   : > { %2133 = vst.msk [vmem:[%s3160_s22 + $0x30] sm:$0xff] %vm2126_vm3, %v2004_v33  ;;  %2197 = vst.msk [vmem:[%s3160_s22 + $0x230] sm:$0xff] %vm2126_vm3, %v2068_v34  ;;  %v1253_v38 = vpop.f32.mrf.mxu0  ;;  %v1509_v39 = vpop.f32.mrf.mxu1  ;;  %v2797_v34 = vld [vmem:[%s2957_s13 + $0x3f4] ss:$8 sps:$4 sm:$0xff]  }
 0x11b   : > { %vm1743_vm4 = vcmp.ge.f32.partialorder %v1252_v35, 0.0  ;;  %v1877_v41 = vmul.f32 %v3144_v59, %v1252_v35  ;;  %vm1807_vm5 = vcmp.ge.f32.partialorder %v1508_v36, 0.0  ;;  %v1941_v42 = vmul.f32 %v3144_v59, %v1508_v36  ;;  %v265_v39 = vld [vmem:[%s2957_s13 + $0x1f0] sm:$0xff] }
 0x11c   : > { %v1256_v43 = vpop.f32.mrf.mxu0  ;;  %1447 = vmatmul.mubr.bf16.gmra.mxu0 %v2396_v31  ;;  %v1512_v44 = vpop.f32.mrf.mxu1  ;;  %1703 = vmatmul.mubr.bf16.gmra.mxu1 %v2460_v32  ;;  %v2795_v31 = vld [vmem:[%s2957_s13 + $0x1f4] ss:$8 sps:$4 sm:$0xff]  }
 0x11d   : > { %v2005_v46 = vsel %vm1743_vm4, %v1252_v35, %v1877_v41  ;;  %v2069_v47 = vsel %vm1807_vm5, %v1508_v36, %v1941_v42  ;;  %v1257_v48 = vadd.f32 %v3135_v57, %v1256_v43  ;;  %v1513_v49 = vadd.f32 %v3135_v57, %v1512_v44  ;;  %2507 = vmatprep.mubr.msk.bf16.mxu0 %vm990_vm0, %v2787_v37  ;;  %v266_v44 = vld [vmem:[%s2957_s13 + $0x1f8] sm:$0xff] }
 0x11e   : > { %2134 = vst.msk [vmem:[%s3160_s22 + $0x38] sm:$0xff] %vm2126_vm3, %v2005_v46  ;;  %2198 = vst.msk [vmem:[%s3160_s22 + $0x238] sm:$0xff] %vm2126_vm3, %v2069_v47  ;;  %v1258_v53 = vpop.f32.mrf.mxu0  ;;  %v1514_v54 = vpop.f32.mrf.mxu1  ;;  %2539 = vmatprep.mubr.msk.bf16.mxu1 %vm990_vm0, %v2789_v40  ;;  %v330_v46 = vld [vmem:[%s2957_s13 + $0x3f8] sm:$0xff] }
 0x11f   : > { %vm1744_vm6 = vcmp.ge.f32.partialorder %v1257_v48, 0.0  ;;  %v1878_v55 = vmul.f32 %v3144_v59, %v1257_v48  ;;  %vm1808_vm7 = vcmp.ge.f32.partialorder %v1513_v49, 0.0  ;;  %v1942_v56 = vmul.f32 %v3144_v59, %v1513_v49 }
 0x120   : > { %v1259_v58 = vpop.f32.mrf.mxu0  ;;  %v1515_v60 = vpop.f32.mrf.mxu1  ;;  %v2402_v53 = vcombine.low %v265_v39, %v266_v44  ;;  %v2466_v54 = vcombine.low %v329_v45, %v330_v46 }
 0x121   : > { %v2006_v63 = vsel %vm1744_vm6, %v1257_v48, %v1878_v55  ;;  %v2070_v0 = vsel %vm1808_vm7, %v1513_v49, %v1942_v56  ;;  %v1260_v1 = vadd.f32 %v3135_v57, %v1259_v58  ;;  %v1516_v2 = vadd.f32 %v3135_v57, %v1515_v60 }
 0x122   : > { %2135 = vst.msk [vmem:[%s3160_s22 + $0x40] sm:$0xff] %vm2126_vm3, %v2006_v63  ;;  %2199 = vst.msk [vmem:[%s3160_s22 + $0x240] sm:$0xff] %vm2126_vm3, %v2070_v0  ;;  %v1261_v4 = vpop.f32.mrf.mxu0  ;;  %v1517_v5 = vpop.f32.mrf.mxu1 }
 0x123   : > { %vm1745_vm8 = vcmp.ge.f32.partialorder %v1260_v1, 0.0  ;;  %v1879_v7 = vmul.f32 %v3144_v59, %v1260_v1  ;;  %vm1809_vm9 = vcmp.ge.f32.partialorder %v1516_v2, 0.0  ;;  %v1943_v8 = vmul.f32 %v3144_v59, %v1516_v2 }
 0x124   : > { %v1264_v9 = vpop.f32.mrf.mxu0  ;;  %1455 = vmatmul.mubr.bf16.gmra.mxu0 %v2398_v61  ;;  %v1520_v10 = vpop.f32.mrf.mxu1  ;;  %1711 = vmatmul.mubr.bf16.gmra.mxu1 %v2462_v62 }
 0x125   : > { %v2007_v12 = vsel %vm1745_vm8, %v1260_v1, %v1879_v7  ;;  %v2071_v13 = vsel %vm1809_vm9, %v1516_v2, %v1943_v8  ;;  %v1265_v14 = vadd.f32 %v3135_v57, %v1264_v9  ;;  %v1521_v15 = vadd.f32 %v3135_v57, %v1520_v10  ;;  %2508 = vmatprep.mubr.msk.bf16.mxu0 %vm990_vm0, %v2791_v3 }
 0x126   : > { %2136 = vst.msk [vmem:[%s3160_s22 + $0x48] sm:$0xff] %vm2126_vm3, %v2007_v12  ;;  %2200 = vst.msk [vmem:[%s3160_s22 + $0x248] sm:$0xff] %vm2126_vm3, %v2071_v13  ;;  %v1266_v19 = vpop.f32.mrf.mxu0  ;;  %v1522_v20 = vpop.f32.mrf.mxu1  ;;  %2540 = vmatprep.mubr.msk.bf16.mxu1 %vm990_vm0, %v2793_v6 }
 0x127   : > { %vm1746_vm10 = vcmp.ge.f32.partialorder %v1265_v14, 0.0  ;;  %v1880_v21 = vmul.f32 %v3144_v59, %v1265_v14  ;;  %vm1810_vm11 = vcmp.ge.f32.partialorder %v1521_v15, 0.0  ;;  %v1944_v22 = vmul.f32 %v3144_v59, %v1521_v15 }
 0x128   : > { %v1267_v23 = vpop.f32.mrf.mxu0  ;;  %v1523_v24 = vpop.f32.mrf.mxu1 }
 0x129   : > { %v2008_v27 = vsel %vm1746_vm10, %v1265_v14, %v1880_v21  ;;  %v2072_v28 = vsel %vm1810_vm11, %v1521_v15, %v1944_v22  ;;  %v1268_v29 = vadd.f32 %v3135_v57, %v1267_v23  ;;  %v1524_v30 = vadd.f32 %v3135_v57, %v1523_v24 }
 0x12a   : > { %2137 = vst.msk [vmem:[%s3160_s22 + $0x50] sm:$0xff] %vm2126_vm3, %v2008_v27  ;;  %2201 = vst.msk [vmem:[%s3160_s22 + $0x250] sm:$0xff] %vm2126_vm3, %v2072_v28  ;;  %v1269_v32 = vpop.f32.mrf.mxu0  ;;  %v1525_v33 = vpop.f32.mrf.mxu1 }
 0x12b   : > { %vm1747_vm12 = vcmp.ge.f32.partialorder %v1268_v29, 0.0  ;;  %v1881_v35 = vmul.f32 %v3144_v59, %v1268_v29  ;;  %vm1811_vm13 = vcmp.ge.f32.partialorder %v1524_v30, 0.0  ;;  %v1945_v36 = vmul.f32 %v3144_v59, %v1524_v30 }
 0x12c   : > { %v1272_v37 = vpop.f32.mrf.mxu0  ;;  %1463 = vmatmul.mubr.bf16.gmra.mxu0 %v2400_v25  ;;  %v1528_v38 = vpop.f32.mrf.mxu1  ;;  %1719 = vmatmul.mubr.bf16.gmra.mxu1 %v2464_v26 }
 0x12d   : > { %v2009_v40 = vsel %vm1747_vm12, %v1268_v29, %v1881_v35  ;;  %v2073_v41 = vsel %vm1811_vm13, %v1524_v30, %v1945_v36  ;;  %v1273_v42 = vadd.f32 %v3135_v57, %v1272_v37  ;;  %v1529_v43 = vadd.f32 %v3135_v57, %v1528_v38  ;;  %2509 = vmatprep.mubr.msk.bf16.mxu0 %vm990_vm0, %v2795_v31 }
 0x12e   : > { %2138 = vst.msk [vmem:[%s3160_s22 + $0x58] sm:$0xff] %vm2126_vm3, %v2009_v40  ;;  %2202 = vst.msk [vmem:[%s3160_s22 + $0x258] sm:$0xff] %vm2126_vm3, %v2073_v41  ;;  %v1274_v47 = vpop.f32.mrf.mxu0  ;;  %v1530_v48 = vpop.f32.mrf.mxu1  ;;  %2541 = vmatprep.mubr.msk.bf16.mxu1 %vm990_vm0, %v2797_v34 }
 0x12f   : > { %vm1748_vm14 = vcmp.ge.f32.partialorder %v1273_v42, 0.0  ;;  %v1882_v49 = vmul.f32 %v3144_v59, %v1273_v42  ;;  %vm1812_vm15 = vcmp.ge.f32.partialorder %v1529_v43, 0.0  ;;  %v1946_v50 = vmul.f32 %v3144_v59, %v1529_v43 }
 0x130   : > { %v1275_v51 = vpop.f32.mrf.mxu0  ;;  %v1531_v52 = vpop.f32.mrf.mxu1 }
 0x131   : > { %v2010_v55 = vsel %vm1748_vm14, %v1273_v42, %v1882_v49  ;;  %v2074_v56 = vsel %vm1812_vm15, %v1529_v43, %v1946_v50  ;;  %v1276_v58 = vadd.f32 %v3135_v57, %v1275_v51  ;;  %v1532_v60 = vadd.f32 %v3135_v57, %v1531_v52 }
 0x132   : > { %2139 = vst.msk [vmem:[%s3160_s22 + $0x60] sm:$0xff] %vm2126_vm3, %v2010_v55  ;;  %2203 = vst.msk [vmem:[%s3160_s22 + $0x260] sm:$0xff] %vm2126_vm3, %v2074_v56  ;;  %v1277_v61 = vpop.f32.mrf.mxu0  ;;  %v1533_v62 = vpop.f32.mrf.mxu1 }
 0x133   : > { %vm1749_vm0 = vcmp.ge.f32.partialorder %v1276_v58, 0.0  ;;  %v1883_v63 = vmul.f32 %v3144_v59, %v1276_v58  ;;  %vm1813_vm1 = vcmp.ge.f32.partialorder %v1532_v60, 0.0  ;;  %v1947_v0 = vmul.f32 %v3144_v59, %v1532_v60 }
 0x134   : > { %v1280_v1 = vpop.f32.mrf.mxu0  ;;  %1471 = vmatmul.mubr.bf16.gmra.mxu0 %v2402_v53  ;;  %v1536_v2 = vpop.f32.mrf.mxu1  ;;  %1727 = vmatmul.mubr.bf16.gmra.mxu1 %v2466_v54 }
 0x135   : > { %v2011_v3 = vsel %vm1749_vm0, %v1276_v58, %v1883_v63  ;;  %v2075_v4 = vsel %vm1813_vm1, %v1532_v60, %v1947_v0  ;;  %v1281_v5 = vadd.f32 %v3135_v57, %v1280_v1  ;;  %v1537_v6 = vadd.f32 %v3135_v57, %v1536_v2 }
 0x136   : > { %2140 = vst.msk [vmem:[%s3160_s22 + $0x68] sm:$0xff] %vm2126_vm3, %v2011_v3  ;;  %2204 = vst.msk [vmem:[%s3160_s22 + $0x268] sm:$0xff] %vm2126_vm3, %v2075_v4  ;;  %v1282_v7 = vpop.f32.mrf.mxu0  ;;  %v1538_v8 = vpop.f32.mrf.mxu1 }
 0x137   : > { %vm1750_vm2 = vcmp.ge.f32.partialorder %v1281_v5, 0.0  ;;  %v1884_v9 = vmul.f32 %v3144_v59, %v1281_v5  ;;  %vm1814_vm4 = vcmp.ge.f32.partialorder %v1537_v6, 0.0  ;;  %v1948_v10 = vmul.f32 %v3144_v59, %v1537_v6 }
 0x138   : > { %v1283_v11 = vpop.f32.mrf.mxu0  ;;  %v1539_v12 = vpop.f32.mrf.mxu1 }
 0x139   : > { %v2012_v13 = vsel %vm1750_vm2, %v1281_v5, %v1884_v9  ;;  %v2076_v14 = vsel %vm1814_vm4, %v1537_v6, %v1948_v10  ;;  %v1284_v15 = vadd.f32 %v3135_v57, %v1283_v11  ;;  %v1540_v16 = vadd.f32 %v3135_v57, %v1539_v12 }
 0x13a   : > { %2141 = vst.msk [vmem:[%s3160_s22 + $0x70] sm:$0xff] %vm2126_vm3, %v2012_v13  ;;  %2205 = vst.msk [vmem:[%s3160_s22 + $0x270] sm:$0xff] %vm2126_vm3, %v2076_v14  ;;  %v1285_v17 = vpop.f32.mrf.mxu0  ;;  %v1541_v18 = vpop.f32.mrf.mxu1 }
 0x13b   : > { %vm1751_vm5 = vcmp.ge.f32.partialorder %v1284_v15, 0.0  ;;  %v1885_v19 = vmul.f32 %v3144_v59, %v1284_v15  ;;  %vm1815_vm6 = vcmp.ge.f32.partialorder %v1540_v16, 0.0  ;;  %v1949_v20 = vmul.f32 %v3144_v59, %v1540_v16 }
 0x13c   : > { %v1288_v21 = vpop.f32.mrf.mxu0  ;;  %v1544_v22 = vpop.f32.mrf.mxu1 }
 0x13d   : > { %v2013_v23 = vsel %vm1751_vm5, %v1284_v15, %v1885_v19  ;;  %v2077_v24 = vsel %vm1815_vm6, %v1540_v16, %v1949_v20  ;;  %v1289_v25 = vadd.f32 %v3135_v57, %v1288_v21  ;;  %v1545_v26 = vadd.f32 %v3135_v57, %v1544_v22 }
 0x13e   : > { %2142 = vst.msk [vmem:[%s3160_s22 + $0x78] sm:$0xff] %vm2126_vm3, %v2013_v23  ;;  %2206 = vst.msk [vmem:[%s3160_s22 + $0x278] sm:$0xff] %vm2126_vm3, %v2077_v24  ;;  %v1290_v27 = vpop.f32.mrf.mxu0  ;;  %v1546_v28 = vpop.f32.mrf.mxu1 }
 0x13f   : > { %vm1752_vm7 = vcmp.ge.f32.partialorder %v1289_v25, 0.0  ;;  %v1886_v29 = vmul.f32 %v3144_v59, %v1289_v25  ;;  %vm1816_vm8 = vcmp.ge.f32.partialorder %v1545_v26, 0.0  ;;  %v1950_v30 = vmul.f32 %v3144_v59, %v1545_v26 }
 0x140   : > { %v1291_v31 = vpop.f32.mrf.mxu0  ;;  %v1547_v32 = vpop.f32.mrf.mxu1 }
 0x141   : > { %v2014_v33 = vsel %vm1752_vm7, %v1289_v25, %v1886_v29  ;;  %v2078_v34 = vsel %vm1816_vm8, %v1545_v26, %v1950_v30  ;;  %v1292_v35 = vadd.f32 %v3135_v57, %v1291_v31  ;;  %v1548_v36 = vadd.f32 %v3135_v57, %v1547_v32 }
 0x142   : > { %2143 = vst.msk [vmem:[%s3160_s22 + $0x80] sm:$0xff] %vm2126_vm3, %v2014_v33  ;;  %2207 = vst.msk [vmem:[%s3160_s22 + $0x280] sm:$0xff] %vm2126_vm3, %v2078_v34  ;;  %v1293_v37 = vpop.f32.mrf.mxu0  ;;  %v1549_v38 = vpop.f32.mrf.mxu1 }
 0x143   : > { %vm1753_vm9 = vcmp.ge.f32.partialorder %v1292_v35, 0.0  ;;  %v1887_v39 = vmul.f32 %v3144_v59, %v1292_v35  ;;  %vm1817_vm10 = vcmp.ge.f32.partialorder %v1548_v36, 0.0  ;;  %v1951_v40 = vmul.f32 %v3144_v59, %v1548_v36 }
 0x144   : > { %v1296_v41 = vpop.f32.mrf.mxu0  ;;  %v1552_v42 = vpop.f32.mrf.mxu1 }
 0x145   : > { %v2015_v43 = vsel %vm1753_vm9, %v1292_v35, %v1887_v39  ;;  %v2079_v44 = vsel %vm1817_vm10, %v1548_v36, %v1951_v40  ;;  %v1297_v45 = vadd.f32 %v3135_v57, %v1296_v41  ;;  %v1553_v46 = vadd.f32 %v3135_v57, %v1552_v42 }
 0x146   : > { %2144 = vst.msk [vmem:[%s3160_s22 + $0x88] sm:$0xff] %vm2126_vm3, %v2015_v43  ;;  %2208 = vst.msk [vmem:[%s3160_s22 + $0x288] sm:$0xff] %vm2126_vm3, %v2079_v44  ;;  %v1298_v47 = vpop.f32.mrf.mxu0  ;;  %v1554_v48 = vpop.f32.mrf.mxu1 }
 0x147   : > { %vm1754_vm11 = vcmp.ge.f32.partialorder %v1297_v45, 0.0  ;;  %v1888_v49 = vmul.f32 %v3144_v59, %v1297_v45  ;;  %vm1818_vm12 = vcmp.ge.f32.partialorder %v1553_v46, 0.0  ;;  %v1952_v50 = vmul.f32 %v3144_v59, %v1553_v46 }
 0x148   : > { %v1299_v51 = vpop.f32.mrf.mxu0  ;;  %v1555_v52 = vpop.f32.mrf.mxu1 }
 0x149   : > { %v2016_v53 = vsel %vm1754_vm11, %v1297_v45, %v1888_v49  ;;  %v2080_v54 = vsel %vm1818_vm12, %v1553_v46, %v1952_v50  ;;  %v1300_v55 = vadd.f32 %v3135_v57, %v1299_v51  ;;  %v1556_v56 = vadd.f32 %v3135_v57, %v1555_v52 }
 0x14a   : > { %2145 = vst.msk [vmem:[%s3160_s22 + $0x90] sm:$0xff] %vm2126_vm3, %v2016_v53  ;;  %2209 = vst.msk [vmem:[%s3160_s22 + $0x290] sm:$0xff] %vm2126_vm3, %v2080_v54  ;;  %v1301_v58 = vpop.f32.mrf.mxu0  ;;  %v1557_v60 = vpop.f32.mrf.mxu1 }
 0x14b   : > { %vm1755_vm13 = vcmp.ge.f32.partialorder %v1300_v55, 0.0  ;;  %v1889_v61 = vmul.f32 %v3144_v59, %v1300_v55  ;;  %vm1819_vm14 = vcmp.ge.f32.partialorder %v1556_v56, 0.0  ;;  %v1953_v62 = vmul.f32 %v3144_v59, %v1556_v56 }
 0x14c   : > { %v1304_v63 = vpop.f32.mrf.mxu0  ;;  %v1560_v0 = vpop.f32.mrf.mxu1 }
 0x14d   : > { %v2017_v1 = vsel %vm1755_vm13, %v1300_v55, %v1889_v61  ;;  %v2081_v2 = vsel %vm1819_vm14, %v1556_v56, %v1953_v62  ;;  %v1305_v3 = vadd.f32 %v3135_v57, %v1304_v63  ;;  %v1561_v4 = vadd.f32 %v3135_v57, %v1560_v0 }
 0x14e   : > { %2146 = vst.msk [vmem:[%s3160_s22 + $0x98] sm:$0xff] %vm2126_vm3, %v2017_v1  ;;  %2210 = vst.msk [vmem:[%s3160_s22 + $0x298] sm:$0xff] %vm2126_vm3, %v2081_v2  ;;  %v1306_v5 = vpop.f32.mrf.mxu0  ;;  %v1562_v6 = vpop.f32.mrf.mxu1 }
 0x14f   : > { %vm1756_vm15 = vcmp.ge.f32.partialorder %v1305_v3, 0.0  ;;  %v1890_v7 = vmul.f32 %v3144_v59, %v1305_v3  ;;  %vm1820_vm0 = vcmp.ge.f32.partialorder %v1561_v4, 0.0  ;;  %v1954_v8 = vmul.f32 %v3144_v59, %v1561_v4 }
 0x150   : > { %v1307_v9 = vpop.f32.mrf.mxu0  ;;  %v1563_v10 = vpop.f32.mrf.mxu1 }
 0x151   : > { %v2018_v11 = vsel %vm1756_vm15, %v1305_v3, %v1890_v7  ;;  %v2082_v12 = vsel %vm1820_vm0, %v1561_v4, %v1954_v8  ;;  %v1308_v13 = vadd.f32 %v3135_v57, %v1307_v9  ;;  %v1564_v14 = vadd.f32 %v3135_v57, %v1563_v10 }
 0x152   : > { %2147 = vst.msk [vmem:[%s3160_s22 + $0xa0] sm:$0xff] %vm2126_vm3, %v2018_v11  ;;  %2211 = vst.msk [vmem:[%s3160_s22 + $0x2a0] sm:$0xff] %vm2126_vm3, %v2082_v12  ;;  %v1309_v15 = vpop.f32.mrf.mxu0  ;;  %v1565_v16 = vpop.f32.mrf.mxu1 }
 0x153   : > { %vm1757_vm1 = vcmp.ge.f32.partialorder %v1308_v13, 0.0  ;;  %v1891_v17 = vmul.f32 %v3144_v59, %v1308_v13  ;;  %vm1821_vm2 = vcmp.ge.f32.partialorder %v1564_v14, 0.0  ;;  %v1955_v18 = vmul.f32 %v3144_v59, %v1564_v14 }
 0x154   : > { %v1312_v19 = vpop.f32.mrf.mxu0  ;;  %v1568_v20 = vpop.f32.mrf.mxu1 }
 0x155   : > { %v2019_v21 = vsel %vm1757_vm1, %v1308_v13, %v1891_v17  ;;  %v2083_v22 = vsel %vm1821_vm2, %v1564_v14, %v1955_v18  ;;  %v1313_v23 = vadd.f32 %v3135_v57, %v1312_v19  ;;  %v1569_v24 = vadd.f32 %v3135_v57, %v1568_v20 }
 0x156   : > { %2148 = vst.msk [vmem:[%s3160_s22 + $0xa8] sm:$0xff] %vm2126_vm3, %v2019_v21  ;;  %2212 = vst.msk [vmem:[%s3160_s22 + $0x2a8] sm:$0xff] %vm2126_vm3, %v2083_v22  ;;  %v1314_v25 = vpop.f32.mrf.mxu0  ;;  %v1570_v26 = vpop.f32.mrf.mxu1 }
 0x157   : > { %vm1758_vm4 = vcmp.ge.f32.partialorder %v1313_v23, 0.0  ;;  %v1892_v27 = vmul.f32 %v3144_v59, %v1313_v23  ;;  %vm1822_vm5 = vcmp.ge.f32.partialorder %v1569_v24, 0.0  ;;  %v1956_v28 = vmul.f32 %v3144_v59, %v1569_v24 }
 0x158   : > { %v1315_v29 = vpop.f32.mrf.mxu0  ;;  %v1571_v30 = vpop.f32.mrf.mxu1 }
 0x159   : > { %v2020_v31 = vsel %vm1758_vm4, %v1313_v23, %v1892_v27  ;;  %v2084_v32 = vsel %vm1822_vm5, %v1569_v24, %v1956_v28  ;;  %v1316_v33 = vadd.f32 %v3135_v57, %v1315_v29  ;;  %v1572_v34 = vadd.f32 %v3135_v57, %v1571_v30 }
 0x15a   : > { %2149 = vst.msk [vmem:[%s3160_s22 + $0xb0] sm:$0xff] %vm2126_vm3, %v2020_v31  ;;  %2213 = vst.msk [vmem:[%s3160_s22 + $0x2b0] sm:$0xff] %vm2126_vm3, %v2084_v32  ;;  %v1317_v35 = vpop.f32.mrf.mxu0  ;;  %v1573_v36 = vpop.f32.mrf.mxu1 }
 0x15b   : > { %vm1759_vm6 = vcmp.ge.f32.partialorder %v1316_v33, 0.0  ;;  %v1893_v37 = vmul.f32 %v3144_v59, %v1316_v33  ;;  %vm1823_vm7 = vcmp.ge.f32.partialorder %v1572_v34, 0.0  ;;  %v1957_v38 = vmul.f32 %v3144_v59, %v1572_v34 }
 0x15c   : > { %v1320_v39 = vpop.f32.mrf.mxu0  ;;  %v1576_v40 = vpop.f32.mrf.mxu1 }
 0x15d   : > { %v2021_v41 = vsel %vm1759_vm6, %v1316_v33, %v1893_v37  ;;  %v2085_v42 = vsel %vm1823_vm7, %v1572_v34, %v1957_v38  ;;  %v1321_v43 = vadd.f32 %v3135_v57, %v1320_v39  ;;  %v1577_v44 = vadd.f32 %v3135_v57, %v1576_v40 }
 0x15e   : > { %2150 = vst.msk [vmem:[%s3160_s22 + $0xb8] sm:$0xff] %vm2126_vm3, %v2021_v41  ;;  %2214 = vst.msk [vmem:[%s3160_s22 + $0x2b8] sm:$0xff] %vm2126_vm3, %v2085_v42  ;;  %v1322_v45 = vpop.f32.mrf.mxu0  ;;  %v1578_v46 = vpop.f32.mrf.mxu1 }
 0x15f   : > { %vm1760_vm8 = vcmp.ge.f32.partialorder %v1321_v43, 0.0  ;;  %v1894_v47 = vmul.f32 %v3144_v59, %v1321_v43  ;;  %vm1824_vm9 = vcmp.ge.f32.partialorder %v1577_v44, 0.0  ;;  %v1958_v48 = vmul.f32 %v3144_v59, %v1577_v44 }
 0x160   : > { %v1323_v49 = vpop.f32.mrf.mxu0  ;;  %v1579_v50 = vpop.f32.mrf.mxu1 }
 0x161   : > { %v2022_v51 = vsel %vm1760_vm8, %v1321_v43, %v1894_v47  ;;  %v2086_v52 = vsel %vm1824_vm9, %v1577_v44, %v1958_v48  ;;  %v1324_v53 = vadd.f32 %v3135_v57, %v1323_v49  ;;  %v1580_v54 = vadd.f32 %v3135_v57, %v1579_v50  ;;  %v3455_v50 = vld [vmem:[%s3778_s2] ss:$0 sm:$0xff] }
 0x162   : > { %2151 = vst.msk [vmem:[%s3160_s22 + $0xc0] sm:$0xff] %vm2126_vm3, %v2022_v51  ;;  %2215 = vst.msk [vmem:[%s3160_s22 + $0x2c0] sm:$0xff] %vm2126_vm3, %v2086_v52  ;;  %v1325_v55 = vpop.f32.mrf.mxu0  ;;  %v1581_v56 = vpop.f32.mrf.mxu1 }
 0x163   : > { %vm1761_vm10 = vcmp.ge.f32.partialorder %v1324_v53, 0.0  ;;  %v1895_v58 = vmul.f32 %v3144_v59, %v1324_v53  ;;  %vm1825_vm11 = vcmp.ge.f32.partialorder %v1580_v54, 0.0  ;;  %v1959_v60 = vmul.f32 %v3144_v59, %v1580_v54 }
 0x164   : > { %v1328_v61 = vpop.f32.mrf.mxu0  ;;  %v1584_v62 = vpop.f32.mrf.mxu1 }
 0x165   : > { %v2023_v63 = vsel %vm1761_vm10, %v1324_v53, %v1895_v58  ;;  %v2087_v0 = vsel %vm1825_vm11, %v1580_v54, %v1959_v60  ;;  %v1329_v1 = vadd.f32 %v3135_v57, %v1328_v61  ;;  %v1585_v2 = vadd.f32 %v3135_v57, %v1584_v62 }
 0x166   : > { %2152 = vst.msk [vmem:[%s3160_s22 + $0xc8] sm:$0xff] %vm2126_vm3, %v2023_v63  ;;  %2216 = vst.msk [vmem:[%s3160_s22 + $0x2c8] sm:$0xff] %vm2126_vm3, %v2087_v0  ;;  %v1330_v3 = vpop.f32.mrf.mxu0  ;;  %v1586_v4 = vpop.f32.mrf.mxu1 }
 0x167   : > { %vm1762_vm12 = vcmp.ge.f32.partialorder %v1329_v1, 0.0  ;;  %v1896_v5 = vmul.f32 %v3144_v59, %v1329_v1  ;;  %vm1826_vm13 = vcmp.ge.f32.partialorder %v1585_v2, 0.0  ;;  %v1960_v6 = vmul.f32 %v3144_v59, %v1585_v2 }
 0x168   : > { %v1331_v7 = vpop.f32.mrf.mxu0  ;;  %v1587_v8 = vpop.f32.mrf.mxu1 }
 0x169   : > { %v2024_v9 = vsel %vm1762_vm12, %v1329_v1, %v1896_v5  ;;  %v2088_v10 = vsel %vm1826_vm13, %v1585_v2, %v1960_v6  ;;  %v1332_v11 = vadd.f32 %v3135_v57, %v1331_v7  ;;  %v1588_v12 = vadd.f32 %v3135_v57, %v1587_v8 }
 0x16a   : > { %2153 = vst.msk [vmem:[%s3160_s22 + $0xd0] sm:$0xff] %vm2126_vm3, %v2024_v9  ;;  %2217 = vst.msk [vmem:[%s3160_s22 + $0x2d0] sm:$0xff] %vm2126_vm3, %v2088_v10  ;;  %v1333_v13 = vpop.f32.mrf.mxu0  ;;  %v1589_v14 = vpop.f32.mrf.mxu1 }
 0x16b   : > { %vm1763_vm14 = vcmp.ge.f32.partialorder %v1332_v11, 0.0  ;;  %v1897_v15 = vmul.f32 %v3144_v59, %v1332_v11  ;;  %vm1827_vm15 = vcmp.ge.f32.partialorder %v1588_v12, 0.0  ;;  %v1961_v16 = vmul.f32 %v3144_v59, %v1588_v12 }
 0x16c   : > { %v1336_v17 = vpop.f32.mrf.mxu0  ;;  %v1592_v18 = vpop.f32.mrf.mxu1 }
 0x16d   : > { %v2025_v19 = vsel %vm1763_vm14, %v1332_v11, %v1897_v15  ;;  %v2089_v20 = vsel %vm1827_vm15, %v1588_v12, %v1961_v16  ;;  %v1337_v21 = vadd.f32 %v3135_v57, %v1336_v17  ;;  %v1593_v22 = vadd.f32 %v3135_v57, %v1592_v18 }
 0x16e   : > { %2154 = vst.msk [vmem:[%s3160_s22 + $0xd8] sm:$0xff] %vm2126_vm3, %v2025_v19  ;;  %2218 = vst.msk [vmem:[%s3160_s22 + $0x2d8] sm:$0xff] %vm2126_vm3, %v2089_v20  ;;  %v1338_v23 = vpop.f32.mrf.mxu0  ;;  %v1594_v24 = vpop.f32.mrf.mxu1 }
 0x16f   : > { %vm1764_vm0 = vcmp.ge.f32.partialorder %v1337_v21, 0.0  ;;  %v1898_v25 = vmul.f32 %v3144_v59, %v1337_v21  ;;  %vm1828_vm1 = vcmp.ge.f32.partialorder %v1593_v22, 0.0  ;;  %v1962_v26 = vmul.f32 %v3144_v59, %v1593_v22 }
 0x170   : > { %v1339_v27 = vpop.f32.mrf.mxu0  ;;  %v1595_v28 = vpop.f32.mrf.mxu1 }
 0x171   : > { %v2026_v29 = vsel %vm1764_vm0, %v1337_v21, %v1898_v25  ;;  %v2090_v30 = vsel %vm1828_vm1, %v1593_v22, %v1962_v26  ;;  %v1340_v31 = vadd.f32 %v3135_v57, %v1339_v27  ;;  %v1596_v32 = vadd.f32 %v3135_v57, %v1595_v28 }
 0x172   : > { %2155 = vst.msk [vmem:[%s3160_s22 + $0xe0] sm:$0xff] %vm2126_vm3, %v2026_v29  ;;  %2219 = vst.msk [vmem:[%s3160_s22 + $0x2e0] sm:$0xff] %vm2126_vm3, %v2090_v30  ;;  %v1341_v33 = vpop.f32.mrf.mxu0  ;;  %v1597_v34 = vpop.f32.mrf.mxu1 }
 0x173   : > { %vm1765_vm2 = vcmp.ge.f32.partialorder %v1340_v31, 0.0  ;;  %v1899_v35 = vmul.f32 %v3144_v59, %v1340_v31  ;;  %vm1829_vm4 = vcmp.ge.f32.partialorder %v1596_v32, 0.0  ;;  %v1963_v36 = vmul.f32 %v3144_v59, %v1596_v32  ;;  %v3448_v59 = vld [vmem:[%s3779_s3] ss:$0 sm:$0xff] }
 0x174   : > { %v1344_v37 = vpop.f32.mrf.mxu0  ;;  %v1600_v38 = vpop.f32.mrf.mxu1 }
 0x175   : > { %v2027_v39 = vsel %vm1765_vm2, %v1340_v31, %v1899_v35  ;;  %v2091_v40 = vsel %vm1829_vm4, %v1596_v32, %v1963_v36  ;;  %v1345_v41 = vadd.f32 %v3135_v57, %v1344_v37  ;;  %v1601_v42 = vadd.f32 %v3135_v57, %v1600_v38 }
 0x176   : > { %2156 = vst.msk [vmem:[%s3160_s22 + $0xe8] sm:$0xff] %vm2126_vm3, %v2027_v39  ;;  %2220 = vst.msk [vmem:[%s3160_s22 + $0x2e8] sm:$0xff] %vm2126_vm3, %v2091_v40  ;;  %v1346_v43 = vpop.f32.mrf.mxu0  ;;  %v1602_v44 = vpop.f32.mrf.mxu1 }
 0x177   : > { %vm1766_vm5 = vcmp.ge.f32.partialorder %v1345_v41, 0.0  ;;  %v1900_v45 = vmul.f32 %v3448_v59, %v1345_v41  ;;  %vm1830_vm6 = vcmp.ge.f32.partialorder %v1601_v42, 0.0  ;;  %v1964_v46 = vmul.f32 %v3448_v59, %v1601_v42 }
 0x178   : > { %v1347_v57 = vpop.f32.mrf.mxu0  ;;  %v1603_v47 = vpop.f32.mrf.mxu1 }
 0x179   : > { %v2028_v48 = vsel %vm1766_vm5, %v1345_v41, %v1900_v45  ;;  %v2092_v49 = vsel %vm1830_vm6, %v1601_v42, %v1964_v46  ;;  %v1348_v51 = vadd.f32 %v3455_v50, %v1347_v57  ;;  %v1604_v52 = vadd.f32 %v3455_v50, %v1603_v47 }
 0x17a   : > { %2157 = vst.msk [vmem:[%s3160_s22 + $0xf0] sm:$0xff] %vm2126_vm3, %v2028_v48  ;;  %2221 = vst.msk [vmem:[%s3160_s22 + $0x2f0] sm:$0xff] %vm2126_vm3, %v2092_v49  ;;  %v1349_v53 = vpop.f32.mrf.mxu0  ;;  %v1605_v54 = vpop.f32.mrf.mxu1 }
 0x17b   : > { %vm1767_vm7 = vcmp.ge.f32.partialorder %v1348_v51, 0.0  ;;  %v1901_v55 = vmul.f32 %v3448_v59, %v1348_v51  ;;  %vm1831_vm8 = vcmp.ge.f32.partialorder %v1604_v52, 0.0  ;;  %v1965_v56 = vmul.f32 %v3448_v59, %v1604_v52 }
 0x17c   : > { %v1352_v58 = vpop.f32.mrf.mxu0  ;;  %v1608_v60 = vpop.f32.mrf.mxu1 }
 0x17d   : > { %v2029_v61 = vsel %vm1767_vm7, %v1348_v51, %v1901_v55  ;;  %v2093_v62 = vsel %vm1831_vm8, %v1604_v52, %v1965_v56  ;;  %v1353_v63 = vadd.f32 %v3455_v50, %v1352_v58  ;;  %v1609_v0 = vadd.f32 %v3455_v50, %v1608_v60 }
 0x17e   : > { %2158 = vst.msk [vmem:[%s3160_s22 + $0xf8] sm:$0xff] %vm2126_vm3, %v2029_v61  ;;  %2222 = vst.msk [vmem:[%s3160_s22 + $0x2f8] sm:$0xff] %vm2126_vm3, %v2093_v62  ;;  %v1354_v1 = vpop.f32.mrf.mxu0  ;;  %v1610_v2 = vpop.f32.mrf.mxu1 }
 0x17f   : > { %vm1768_vm9 = vcmp.ge.f32.partialorder %v1353_v63, 0.0  ;;  %v1902_v3 = vmul.f32 %v3448_v59, %v1353_v63  ;;  %vm1832_vm10 = vcmp.ge.f32.partialorder %v1609_v0, 0.0  ;;  %v1966_v4 = vmul.f32 %v3448_v59, %v1609_v0 }
 0x180   : > { %v1355_v5 = vpop.f32.mrf.mxu0  ;;  %v1611_v6 = vpop.f32.mrf.mxu1 }
 0x181   : > { %v2030_v7 = vsel %vm1768_vm9, %v1353_v63, %v1902_v3  ;;  %v2094_v8 = vsel %vm1832_vm10, %v1609_v0, %v1966_v4  ;;  %v1356_v9 = vadd.f32 %v3455_v50, %v1355_v5  ;;  %v1612_v10 = vadd.f32 %v3455_v50, %v1611_v6 }
 0x182   : > { %2159 = vst.msk [vmem:[%s3160_s22 + $0x100] sm:$0xff] %vm2126_vm3, %v2030_v7  ;;  %2223 = vst.msk [vmem:[%s3160_s22 + $0x300] sm:$0xff] %vm2126_vm3, %v2094_v8  ;;  %v1357_v11 = vpop.f32.mrf.mxu0  ;;  %v1613_v12 = vpop.f32.mrf.mxu1 }
 0x183   : > { %vm1769_vm11 = vcmp.ge.f32.partialorder %v1356_v9, 0.0  ;;  %v1903_v13 = vmul.f32 %v3448_v59, %v1356_v9  ;;  %vm1833_vm12 = vcmp.ge.f32.partialorder %v1612_v10, 0.0  ;;  %v1967_v14 = vmul.f32 %v3448_v59, %v1612_v10 }
 0x184   : > { %v1360_v15 = vpop.f32.mrf.mxu0  ;;  %v1616_v16 = vpop.f32.mrf.mxu1 }
 0x185   : > { %v2031_v17 = vsel %vm1769_vm11, %v1356_v9, %v1903_v13  ;;  %v2095_v18 = vsel %vm1833_vm12, %v1612_v10, %v1967_v14  ;;  %v1361_v19 = vadd.f32 %v3455_v50, %v1360_v15  ;;  %v1617_v20 = vadd.f32 %v3455_v50, %v1616_v16 }
 0x186   : > { %2160 = vst.msk [vmem:[%s3160_s22 + $0x108] sm:$0xff] %vm2126_vm3, %v2031_v17  ;;  %2224 = vst.msk [vmem:[%s3160_s22 + $0x308] sm:$0xff] %vm2126_vm3, %v2095_v18  ;;  %v1362_v21 = vpop.f32.mrf.mxu0  ;;  %v1618_v22 = vpop.f32.mrf.mxu1 }
 0x187   : > { %vm1770_vm13 = vcmp.ge.f32.partialorder %v1361_v19, 0.0  ;;  %v1904_v23 = vmul.f32 %v3448_v59, %v1361_v19  ;;  %vm1834_vm14 = vcmp.ge.f32.partialorder %v1617_v20, 0.0  ;;  %v1968_v24 = vmul.f32 %v3448_v59, %v1617_v20 }
 0x188   : > { %v1363_v25 = vpop.f32.mrf.mxu0  ;;  %v1619_v26 = vpop.f32.mrf.mxu1 }
 0x189   : > { %v2032_v27 = vsel %vm1770_vm13, %v1361_v19, %v1904_v23  ;;  %v2096_v28 = vsel %vm1834_vm14, %v1617_v20, %v1968_v24  ;;  %v1364_v29 = vadd.f32 %v3455_v50, %v1363_v25  ;;  %v1620_v30 = vadd.f32 %v3455_v50, %v1619_v26 }
 0x18a   : > { %2161 = vst.msk [vmem:[%s3160_s22 + $0x110] sm:$0xff] %vm2126_vm3, %v2032_v27  ;;  %2225 = vst.msk [vmem:[%s3160_s22 + $0x310] sm:$0xff] %vm2126_vm3, %v2096_v28  ;;  %v1365_v31 = vpop.f32.mrf.mxu0  ;;  %v1621_v32 = vpop.f32.mrf.mxu1 }
 0x18b   : > { %vm1771_vm15 = vcmp.ge.f32.partialorder %v1364_v29, 0.0  ;;  %v1905_v33 = vmul.f32 %v3448_v59, %v1364_v29  ;;  %vm1835_vm0 = vcmp.ge.f32.partialorder %v1620_v30, 0.0  ;;  %v1969_v34 = vmul.f32 %v3448_v59, %v1620_v30 }
 0x18c   : > { %v1368_v35 = vpop.f32.mrf.mxu0  ;;  %v1624_v36 = vpop.f32.mrf.mxu1 }
 0x18d   : > { %v2033_v37 = vsel %vm1771_vm15, %v1364_v29, %v1905_v33  ;;  %v2097_v38 = vsel %vm1835_vm0, %v1620_v30, %v1969_v34  ;;  %v1369_v39 = vadd.f32 %v3455_v50, %v1368_v35  ;;  %v1625_v40 = vadd.f32 %v3455_v50, %v1624_v36 }
 0x18e   : > { %2162 = vst.msk [vmem:[%s3160_s22 + $0x118] sm:$0xff] %vm2126_vm3, %v2033_v37  ;;  %2226 = vst.msk [vmem:[%s3160_s22 + $0x318] sm:$0xff] %vm2126_vm3, %v2097_v38  ;;  %v1370_v41 = vpop.f32.mrf.mxu0  ;;  %v1626_v42 = vpop.f32.mrf.mxu1 }
 0x18f   : > { %vm1772_vm1 = vcmp.ge.f32.partialorder %v1369_v39, 0.0  ;;  %v1906_v43 = vmul.f32 %v3448_v59, %v1369_v39  ;;  %vm1836_vm2 = vcmp.ge.f32.partialorder %v1625_v40, 0.0  ;;  %v1970_v44 = vmul.f32 %v3448_v59, %v1625_v40 }
 0x190   : > { %v1371_v45 = vpop.f32.mrf.mxu0  ;;  %v1627_v46 = vpop.f32.mrf.mxu1 }
 0x191   : > { %v2034_v57 = vsel %vm1772_vm1, %v1369_v39, %v1906_v43  ;;  %v2098_v47 = vsel %vm1836_vm2, %v1625_v40, %v1970_v44  ;;  %v1372_v48 = vadd.f32 %v3455_v50, %v1371_v45  ;;  %v1628_v49 = vadd.f32 %v3455_v50, %v1627_v46 }
 0x192   : > { %2163 = vst.msk [vmem:[%s3160_s22 + $0x120] sm:$0xff] %vm2126_vm3, %v2034_v57  ;;  %2227 = vst.msk [vmem:[%s3160_s22 + $0x320] sm:$0xff] %vm2126_vm3, %v2098_v47  ;;  %v1373_v51 = vpop.f32.mrf.mxu0  ;;  %v1629_v52 = vpop.f32.mrf.mxu1 }
 0x193   : > { %vm1773_vm4 = vcmp.ge.f32.partialorder %v1372_v48, 0.0  ;;  %v1907_v53 = vmul.f32 %v3448_v59, %v1372_v48  ;;  %vm1837_vm5 = vcmp.ge.f32.partialorder %v1628_v49, 0.0  ;;  %v1971_v54 = vmul.f32 %v3448_v59, %v1628_v49 }
 0x194   : > { %v1376_v55 = vpop.f32.mrf.mxu0  ;;  %v1632_v56 = vpop.f32.mrf.mxu1 }
 0x195   : > { %v2035_v58 = vsel %vm1773_vm4, %v1372_v48, %v1907_v53  ;;  %v2099_v60 = vsel %vm1837_vm5, %v1628_v49, %v1971_v54  ;;  %v1377_v61 = vadd.f32 %v3455_v50, %v1376_v55  ;;  %v1633_v62 = vadd.f32 %v3455_v50, %v1632_v56 }
 0x196   : > { %2164 = vst.msk [vmem:[%s3160_s22 + $0x128] sm:$0xff] %vm2126_vm3, %v2035_v58  ;;  %2228 = vst.msk [vmem:[%s3160_s22 + $0x328] sm:$0xff] %vm2126_vm3, %v2099_v60  ;;  %v1378_v63 = vpop.f32.mrf.mxu0  ;;  %v1634_v0 = vpop.f32.mrf.mxu1 }
 0x197   : > { %vm1774_vm6 = vcmp.ge.f32.partialorder %v1377_v61, 0.0  ;;  %v1908_v1 = vmul.f32 %v3448_v59, %v1377_v61  ;;  %vm1838_vm7 = vcmp.ge.f32.partialorder %v1633_v62, 0.0  ;;  %v1972_v2 = vmul.f32 %v3448_v59, %v1633_v62 }
 0x198   : > { %v1379_v3 = vpop.f32.mrf.mxu0  ;;  %v1635_v4 = vpop.f32.mrf.mxu1 }
 0x199   : > { %v2036_v5 = vsel %vm1774_vm6, %v1377_v61, %v1908_v1  ;;  %v2100_v6 = vsel %vm1838_vm7, %v1633_v62, %v1972_v2  ;;  %v1380_v7 = vadd.f32 %v3455_v50, %v1379_v3  ;;  %v1636_v8 = vadd.f32 %v3455_v50, %v1635_v4 }
 0x19a   : > { %2165 = vst.msk [vmem:[%s3160_s22 + $0x130] sm:$0xff] %vm2126_vm3, %v2036_v5  ;;  %2229 = vst.msk [vmem:[%s3160_s22 + $0x330] sm:$0xff] %vm2126_vm3, %v2100_v6  ;;  %v1381_v9 = vpop.f32.mrf.mxu0  ;;  %v1637_v10 = vpop.f32.mrf.mxu1 }
 0x19b   : > { %vm1775_vm8 = vcmp.ge.f32.partialorder %v1380_v7, 0.0  ;;  %v1909_v11 = vmul.f32 %v3448_v59, %v1380_v7  ;;  %vm1839_vm9 = vcmp.ge.f32.partialorder %v1636_v8, 0.0  ;;  %v1973_v12 = vmul.f32 %v3448_v59, %v1636_v8 }
 0x19c   : > { %v1384_v13 = vpop.f32.mrf.mxu0  ;;  %v1640_v14 = vpop.f32.mrf.mxu1 }
 0x19d   : > { %v2037_v15 = vsel %vm1775_vm8, %v1380_v7, %v1909_v11  ;;  %v2101_v16 = vsel %vm1839_vm9, %v1636_v8, %v1973_v12  ;;  %v1385_v17 = vadd.f32 %v3455_v50, %v1384_v13  ;;  %v1641_v18 = vadd.f32 %v3455_v50, %v1640_v14 }
 0x19e   : > { %2166 = vst.msk [vmem:[%s3160_s22 + $0x138] sm:$0xff] %vm2126_vm3, %v2037_v15  ;;  %2230 = vst.msk [vmem:[%s3160_s22 + $0x338] sm:$0xff] %vm2126_vm3, %v2101_v16  ;;  %v1386_v19 = vpop.f32.mrf.mxu0  ;;  %v1642_v20 = vpop.f32.mrf.mxu1 }
 0x19f   : > { %vm1776_vm10 = vcmp.ge.f32.partialorder %v1385_v17, 0.0  ;;  %v1910_v21 = vmul.f32 %v3448_v59, %v1385_v17  ;;  %vm1840_vm11 = vcmp.ge.f32.partialorder %v1641_v18, 0.0  ;;  %v1974_v22 = vmul.f32 %v3448_v59, %v1641_v18 }
 0x1a0   : > { %v1387_v23 = vpop.f32.mrf.mxu0  ;;  %v1643_v24 = vpop.f32.mrf.mxu1 }
 0x1a1   : > { %v2038_v25 = vsel %vm1776_vm10, %v1385_v17, %v1910_v21  ;;  %v2102_v26 = vsel %vm1840_vm11, %v1641_v18, %v1974_v22  ;;  %v1388_v27 = vadd.f32 %v3455_v50, %v1387_v23  ;;  %v1644_v28 = vadd.f32 %v3455_v50, %v1643_v24 }
 0x1a2   : > { %2167 = vst.msk [vmem:[%s3160_s22 + $0x140] sm:$0xff] %vm2126_vm3, %v2038_v25  ;;  %2231 = vst.msk [vmem:[%s3160_s22 + $0x340] sm:$0xff] %vm2126_vm3, %v2102_v26  ;;  %v1389_v29 = vpop.f32.mrf.mxu0  ;;  %v1645_v30 = vpop.f32.mrf.mxu1 }
 0x1a3   : > { %vm1777_vm12 = vcmp.ge.f32.partialorder %v1388_v27, 0.0  ;;  %v1911_v31 = vmul.f32 %v3448_v59, %v1388_v27  ;;  %vm1841_vm13 = vcmp.ge.f32.partialorder %v1644_v28, 0.0  ;;  %v1975_v32 = vmul.f32 %v3448_v59, %v1644_v28 }
 0x1a4   : > { %v1392_v33 = vpop.f32.mrf.mxu0  ;;  %v1648_v34 = vpop.f32.mrf.mxu1 }
 0x1a5   : > { %v2039_v35 = vsel %vm1777_vm12, %v1388_v27, %v1911_v31  ;;  %v2103_v36 = vsel %vm1841_vm13, %v1644_v28, %v1975_v32  ;;  %v1393_v37 = vadd.f32 %v3455_v50, %v1392_v33  ;;  %v1649_v38 = vadd.f32 %v3455_v50, %v1648_v34 }
 0x1a6   : > { %2168 = vst.msk [vmem:[%s3160_s22 + $0x148] sm:$0xff] %vm2126_vm3, %v2039_v35  ;;  %2232 = vst.msk [vmem:[%s3160_s22 + $0x348] sm:$0xff] %vm2126_vm3, %v2103_v36  ;;  %v1394_v39 = vpop.f32.mrf.mxu0  ;;  %v1650_v40 = vpop.f32.mrf.mxu1 }
 0x1a7   : > { %vm1778_vm14 = vcmp.ge.f32.partialorder %v1393_v37, 0.0  ;;  %v1912_v41 = vmul.f32 %v3448_v59, %v1393_v37  ;;  %vm1842_vm15 = vcmp.ge.f32.partialorder %v1649_v38, 0.0  ;;  %v1976_v42 = vmul.f32 %v3448_v59, %v1649_v38 }
 0x1a8   : > { %v1395_v43 = vpop.f32.mrf.mxu0  ;;  %v1651_v44 = vpop.f32.mrf.mxu1 }
 0x1a9   : > { %v2040_v45 = vsel %vm1778_vm14, %v1393_v37, %v1912_v41  ;;  %v2104_v46 = vsel %vm1842_vm15, %v1649_v38, %v1976_v42  ;;  %v1396_v57 = vadd.f32 %v3455_v50, %v1395_v43  ;;  %v1652_v47 = vadd.f32 %v3455_v50, %v1651_v44 }
 0x1aa   : > { %2169 = vst.msk [vmem:[%s3160_s22 + $0x150] sm:$0xff] %vm2126_vm3, %v2040_v45  ;;  %2233 = vst.msk [vmem:[%s3160_s22 + $0x350] sm:$0xff] %vm2126_vm3, %v2104_v46  ;;  %v1397_v48 = vpop.f32.mrf.mxu0  ;;  %v1653_v49 = vpop.f32.mrf.mxu1 }
 0x1ab   : > { %vm1779_vm0 = vcmp.ge.f32.partialorder %v1396_v57, 0.0  ;;  %v1913_v51 = vmul.f32 %v3448_v59, %v1396_v57  ;;  %vm1843_vm1 = vcmp.ge.f32.partialorder %v1652_v47, 0.0  ;;  %v1977_v52 = vmul.f32 %v3448_v59, %v1652_v47 }
 0x1ac   : > { %v1400_v53 = vpop.f32.mrf.mxu0  ;;  %v1656_v54 = vpop.f32.mrf.mxu1 }
 0x1ad   : > { %v2041_v55 = vsel %vm1779_vm0, %v1396_v57, %v1913_v51  ;;  %v2105_v56 = vsel %vm1843_vm1, %v1652_v47, %v1977_v52  ;;  %v1401_v58 = vadd.f32 %v3455_v50, %v1400_v53  ;;  %v1657_v60 = vadd.f32 %v3455_v50, %v1656_v54 }
 0x1ae   : > { %2170 = vst.msk [vmem:[%s3160_s22 + $0x158] sm:$0xff] %vm2126_vm3, %v2041_v55  ;;  %2234 = vst.msk [vmem:[%s3160_s22 + $0x358] sm:$0xff] %vm2126_vm3, %v2105_v56  ;;  %v1402_v61 = vpop.f32.mrf.mxu0  ;;  %v1658_v62 = vpop.f32.mrf.mxu1 }
 0x1af   : > { %vm1780_vm2 = vcmp.ge.f32.partialorder %v1401_v58, 0.0  ;;  %v1914_v63 = vmul.f32 %v3448_v59, %v1401_v58  ;;  %vm1844_vm4 = vcmp.ge.f32.partialorder %v1657_v60, 0.0  ;;  %v1978_v0 = vmul.f32 %v3448_v59, %v1657_v60 }
 0x1b0   : > { %v1403_v1 = vpop.f32.mrf.mxu0  ;;  %v1659_v2 = vpop.f32.mrf.mxu1 }
 0x1b1   : > { %v2042_v3 = vsel %vm1780_vm2, %v1401_v58, %v1914_v63  ;;  %v2106_v4 = vsel %vm1844_vm4, %v1657_v60, %v1978_v0  ;;  %v1404_v5 = vadd.f32 %v3455_v50, %v1403_v1  ;;  %v1660_v6 = vadd.f32 %v3455_v50, %v1659_v2 }
 0x1b2   : > { %2171 = vst.msk [vmem:[%s3160_s22 + $0x160] sm:$0xff] %vm2126_vm3, %v2042_v3  ;;  %2235 = vst.msk [vmem:[%s3160_s22 + $0x360] sm:$0xff] %vm2126_vm3, %v2106_v4  ;;  %v1405_v7 = vpop.f32.mrf.mxu0  ;;  %v1661_v8 = vpop.f32.mrf.mxu1 }
 0x1b3   : > { %vm1781_vm5 = vcmp.ge.f32.partialorder %v1404_v5, 0.0  ;;  %v1915_v9 = vmul.f32 %v3448_v59, %v1404_v5  ;;  %vm1845_vm6 = vcmp.ge.f32.partialorder %v1660_v6, 0.0  ;;  %v1979_v10 = vmul.f32 %v3448_v59, %v1660_v6 }
 0x1b4   : > { %v1408_v11 = vpop.f32.mrf.mxu0  ;;  %v1664_v12 = vpop.f32.mrf.mxu1 }
 0x1b5   : > { %v2043_v13 = vsel %vm1781_vm5, %v1404_v5, %v1915_v9  ;;  %v2107_v14 = vsel %vm1845_vm6, %v1660_v6, %v1979_v10  ;;  %v1409_v15 = vadd.f32 %v3455_v50, %v1408_v11  ;;  %v1665_v16 = vadd.f32 %v3455_v50, %v1664_v12 }
 0x1b6   : > { %2172 = vst.msk [vmem:[%s3160_s22 + $0x168] sm:$0xff] %vm2126_vm3, %v2043_v13  ;;  %2236 = vst.msk [vmem:[%s3160_s22 + $0x368] sm:$0xff] %vm2126_vm3, %v2107_v14  ;;  %v1410_v17 = vpop.f32.mrf.mxu0  ;;  %v1666_v18 = vpop.f32.mrf.mxu1 }
 0x1b7   : > { %vm1782_vm7 = vcmp.ge.f32.partialorder %v1409_v15, 0.0  ;;  %v1916_v19 = vmul.f32 %v3448_v59, %v1409_v15  ;;  %vm1846_vm8 = vcmp.ge.f32.partialorder %v1665_v16, 0.0  ;;  %v1980_v20 = vmul.f32 %v3448_v59, %v1665_v16 }
 0x1b8   : > { %v1411_v21 = vpop.f32.mrf.mxu0  ;;  %v1667_v22 = vpop.f32.mrf.mxu1 }
 0x1b9   : > { %v2044_v23 = vsel %vm1782_vm7, %v1409_v15, %v1916_v19  ;;  %v2108_v24 = vsel %vm1846_vm8, %v1665_v16, %v1980_v20  ;;  %v1412_v25 = vadd.f32 %v3455_v50, %v1411_v21  ;;  %v1668_v26 = vadd.f32 %v3455_v50, %v1667_v22 }
 0x1ba   : > { %2173 = vst.msk [vmem:[%s3160_s22 + $0x170] sm:$0xff] %vm2126_vm3, %v2044_v23  ;;  %2237 = vst.msk [vmem:[%s3160_s22 + $0x370] sm:$0xff] %vm2126_vm3, %v2108_v24  ;;  %v1413_v27 = vpop.f32.mrf.mxu0  ;;  %v1669_v28 = vpop.f32.mrf.mxu1 }
 0x1bb   : > { %vm1783_vm9 = vcmp.ge.f32.partialorder %v1412_v25, 0.0  ;;  %v1917_v29 = vmul.f32 %v3448_v59, %v1412_v25  ;;  %vm1847_vm10 = vcmp.ge.f32.partialorder %v1668_v26, 0.0  ;;  %v1981_v30 = vmul.f32 %v3448_v59, %v1668_v26 }
 0x1bc   : > { %v1416_v31 = vpop.f32.mrf.mxu0  ;;  %v1672_v32 = vpop.f32.mrf.mxu1 }
 0x1bd   : > { %v2045_v33 = vsel %vm1783_vm9, %v1412_v25, %v1917_v29  ;;  %v2109_v34 = vsel %vm1847_vm10, %v1668_v26, %v1981_v30  ;;  %v1417_v35 = vadd.f32 %v3455_v50, %v1416_v31  ;;  %v1673_v36 = vadd.f32 %v3455_v50, %v1672_v32 }
 0x1be   : > { %2174 = vst.msk [vmem:[%s3160_s22 + $0x178] sm:$0xff] %vm2126_vm3, %v2045_v33  ;;  %2238 = vst.msk [vmem:[%s3160_s22 + $0x378] sm:$0xff] %vm2126_vm3, %v2109_v34  ;;  %v1418_v37 = vpop.f32.mrf.mxu0  ;;  %v1674_v38 = vpop.f32.mrf.mxu1 }
 0x1bf   : > { %vm1784_vm11 = vcmp.ge.f32.partialorder %v1417_v35, 0.0  ;;  %v1918_v39 = vmul.f32 %v3448_v59, %v1417_v35  ;;  %vm1848_vm12 = vcmp.ge.f32.partialorder %v1673_v36, 0.0  ;;  %v1982_v40 = vmul.f32 %v3448_v59, %v1673_v36 }
 0x1c0   : > { %v1419_v41 = vpop.f32.mrf.mxu0  ;;  %v1675_v42 = vpop.f32.mrf.mxu1 }
 0x1c1   : > { %v2046_v43 = vsel %vm1784_vm11, %v1417_v35, %v1918_v39  ;;  %v2110_v44 = vsel %vm1848_vm12, %v1673_v36, %v1982_v40  ;;  %v1420_v45 = vadd.f32 %v3455_v50, %v1419_v41  ;;  %v1676_v46 = vadd.f32 %v3455_v50, %v1675_v42 }
 0x1c2   : > { %2175 = vst.msk [vmem:[%s3160_s22 + $0x180] sm:$0xff] %vm2126_vm3, %v2046_v43  ;;  %2239 = vst.msk [vmem:[%s3160_s22 + $0x380] sm:$0xff] %vm2126_vm3, %v2110_v44  ;;  %v1421_v57 = vpop.f32.mrf.mxu0  ;;  %v1677_v47 = vpop.f32.mrf.mxu1 }
 0x1c3   : > { %vm1785_vm13 = vcmp.ge.f32.partialorder %v1420_v45, 0.0  ;;  %v1919_v48 = vmul.f32 %v3448_v59, %v1420_v45  ;;  %vm1849_vm14 = vcmp.ge.f32.partialorder %v1676_v46, 0.0  ;;  %v1983_v49 = vmul.f32 %v3448_v59, %v1676_v46 }
 0x1c4   : > { %v1424_v51 = vpop.f32.mrf.mxu0  ;;  %v1680_v52 = vpop.f32.mrf.mxu1 }
 0x1c5   : > { %v2047_v53 = vsel %vm1785_vm13, %v1420_v45, %v1919_v48  ;;  %v2111_v54 = vsel %vm1849_vm14, %v1676_v46, %v1983_v49  ;;  %v1425_v55 = vadd.f32 %v3455_v50, %v1424_v51  ;;  %v1681_v56 = vadd.f32 %v3455_v50, %v1680_v52 }
 0x1c6   : > { %2176 = vst.msk [vmem:[%s3160_s22 + $0x188] sm:$0xff] %vm2126_vm3, %v2047_v53  ;;  %2240 = vst.msk [vmem:[%s3160_s22 + $0x388] sm:$0xff] %vm2126_vm3, %v2111_v54  ;;  %v1426_v58 = vpop.f32.mrf.mxu0  ;;  %v1682_v60 = vpop.f32.mrf.mxu1 }
 0x1c7   : > { %vm1786_vm15 = vcmp.ge.f32.partialorder %v1425_v55, 0.0  ;;  %v1920_v61 = vmul.f32 %v3448_v59, %v1425_v55  ;;  %vm1850_vm0 = vcmp.ge.f32.partialorder %v1681_v56, 0.0  ;;  %v1984_v62 = vmul.f32 %v3448_v59, %v1681_v56 }
 0x1c8   : > { %v1427_v63 = vpop.f32.mrf.mxu0  ;;  %v1683_v0 = vpop.f32.mrf.mxu1 }
 0x1c9   : > { %v2048_v1 = vsel %vm1786_vm15, %v1425_v55, %v1920_v61  ;;  %v2112_v2 = vsel %vm1850_vm0, %v1681_v56, %v1984_v62  ;;  %v1428_v3 = vadd.f32 %v3455_v50, %v1427_v63  ;;  %v1684_v4 = vadd.f32 %v3455_v50, %v1683_v0 }
 0x1ca   : > { %2177 = vst.msk [vmem:[%s3160_s22 + $0x190] sm:$0xff] %vm2126_vm3, %v2048_v1  ;;  %2241 = vst.msk [vmem:[%s3160_s22 + $0x390] sm:$0xff] %vm2126_vm3, %v2112_v2  ;;  %v1429_v5 = vpop.f32.mrf.mxu0  ;;  %v1685_v6 = vpop.f32.mrf.mxu1 }
 0x1cb   : > { %vm1787_vm1 = vcmp.ge.f32.partialorder %v1428_v3, 0.0  ;;  %v1921_v7 = vmul.f32 %v3448_v59, %v1428_v3  ;;  %vm1851_vm2 = vcmp.ge.f32.partialorder %v1684_v4, 0.0  ;;  %v1985_v8 = vmul.f32 %v3448_v59, %v1684_v4 }
 0x1cc   : > { %v1432_v9 = vpop.f32.mrf.mxu0  ;;  %v1688_v10 = vpop.f32.mrf.mxu1 }
 0x1cd   : > { %v2049_v11 = vsel %vm1787_vm1, %v1428_v3, %v1921_v7  ;;  %v2113_v12 = vsel %vm1851_vm2, %v1684_v4, %v1985_v8  ;;  %v1433_v13 = vadd.f32 %v3455_v50, %v1432_v9  ;;  %v1689_v14 = vadd.f32 %v3455_v50, %v1688_v10 }
 0x1ce   : > { %2178 = vst.msk [vmem:[%s3160_s22 + $0x198] sm:$0xff] %vm2126_vm3, %v2049_v11  ;;  %2242 = vst.msk [vmem:[%s3160_s22 + $0x398] sm:$0xff] %vm2126_vm3, %v2113_v12  ;;  %v1434_v15 = vpop.f32.mrf.mxu0  ;;  %v1690_v16 = vpop.f32.mrf.mxu1 }
 0x1cf   : > { %vm1788_vm4 = vcmp.ge.f32.partialorder %v1433_v13, 0.0  ;;  %v1922_v17 = vmul.f32 %v3448_v59, %v1433_v13  ;;  %vm1852_vm5 = vcmp.ge.f32.partialorder %v1689_v14, 0.0  ;;  %v1986_v18 = vmul.f32 %v3448_v59, %v1689_v14 }
 0x1d0   : > { %v1435_v19 = vpop.f32.mrf.mxu0  ;;  %v1691_v20 = vpop.f32.mrf.mxu1 }
 0x1d1   : > { %v2050_v21 = vsel %vm1788_vm4, %v1433_v13, %v1922_v17  ;;  %v2114_v22 = vsel %vm1852_vm5, %v1689_v14, %v1986_v18  ;;  %v1436_v23 = vadd.f32 %v3455_v50, %v1435_v19  ;;  %v1692_v24 = vadd.f32 %v3455_v50, %v1691_v20 }
 0x1d2   : > { %2179 = vst.msk [vmem:[%s3160_s22 + $0x1a0] sm:$0xff] %vm2126_vm3, %v2050_v21  ;;  %2243 = vst.msk [vmem:[%s3160_s22 + $0x3a0] sm:$0xff] %vm2126_vm3, %v2114_v22  ;;  %v1437_v25 = vpop.f32.mrf.mxu0  ;;  %v1693_v26 = vpop.f32.mrf.mxu1 }
 0x1d3   : > { %vm1789_vm6 = vcmp.ge.f32.partialorder %v1436_v23, 0.0  ;;  %v1923_v27 = vmul.f32 %v3448_v59, %v1436_v23  ;;  %vm1853_vm7 = vcmp.ge.f32.partialorder %v1692_v24, 0.0  ;;  %v1987_v28 = vmul.f32 %v3448_v59, %v1692_v24 }
 0x1d4   : > { %v1440_v29 = vpop.f32.mrf.mxu0  ;;  %v1696_v30 = vpop.f32.mrf.mxu1 }
 0x1d5   : > { %v2051_v31 = vsel %vm1789_vm6, %v1436_v23, %v1923_v27  ;;  %v2115_v32 = vsel %vm1853_vm7, %v1692_v24, %v1987_v28  ;;  %v1441_v33 = vadd.f32 %v3455_v50, %v1440_v29  ;;  %v1697_v34 = vadd.f32 %v3455_v50, %v1696_v30 }
 0x1d6   : > { %2180 = vst.msk [vmem:[%s3160_s22 + $0x1a8] sm:$0xff] %vm2126_vm3, %v2051_v31  ;;  %2244 = vst.msk [vmem:[%s3160_s22 + $0x3a8] sm:$0xff] %vm2126_vm3, %v2115_v32  ;;  %v1442_v35 = vpop.f32.mrf.mxu0  ;;  %v1698_v36 = vpop.f32.mrf.mxu1 }
 0x1d7   : > { %vm1790_vm8 = vcmp.ge.f32.partialorder %v1441_v33, 0.0  ;;  %v1924_v37 = vmul.f32 %v3448_v59, %v1441_v33  ;;  %vm1854_vm9 = vcmp.ge.f32.partialorder %v1697_v34, 0.0  ;;  %v1988_v38 = vmul.f32 %v3448_v59, %v1697_v34 }
 0x1d8   : > { %v1443_v39 = vpop.f32.mrf.mxu0  ;;  %v1699_v40 = vpop.f32.mrf.mxu1 }
 0x1d9   : > { %v2052_v41 = vsel %vm1790_vm8, %v1441_v33, %v1924_v37  ;;  %v2116_v42 = vsel %vm1854_vm9, %v1697_v34, %v1988_v38  ;;  %v1444_v43 = vadd.f32 %v3455_v50, %v1443_v39  ;;  %v1700_v44 = vadd.f32 %v3455_v50, %v1699_v40 }
 0x1da   : > { %2181 = vst.msk [vmem:[%s3160_s22 + $0x1b0] sm:$0xff] %vm2126_vm3, %v2052_v41  ;;  %2245 = vst.msk [vmem:[%s3160_s22 + $0x3b0] sm:$0xff] %vm2126_vm3, %v2116_v42  ;;  %v1445_v45 = vpop.f32.mrf.mxu0  ;;  %v1701_v46 = vpop.f32.mrf.mxu1 }
 0x1db   : > { %vm1791_vm10 = vcmp.ge.f32.partialorder %v1444_v43, 0.0  ;;  %v1925_v57 = vmul.f32 %v3448_v59, %v1444_v43  ;;  %vm1855_vm11 = vcmp.ge.f32.partialorder %v1700_v44, 0.0  ;;  %v1989_v47 = vmul.f32 %v3448_v59, %v1700_v44 }
 0x1dc   : > { %v1448_v48 = vpop.f32.mrf.mxu0  ;;  %v1704_v49 = vpop.f32.mrf.mxu1 }
 0x1dd   : > { %v2053_v51 = vsel %vm1791_vm10, %v1444_v43, %v1925_v57  ;;  %v2117_v52 = vsel %vm1855_vm11, %v1700_v44, %v1989_v47  ;;  %v1449_v53 = vadd.f32 %v3455_v50, %v1448_v48  ;;  %v1705_v54 = vadd.f32 %v3455_v50, %v1704_v49 }
 0x1de   : > { %2182 = vst.msk [vmem:[%s3160_s22 + $0x1b8] sm:$0xff] %vm2126_vm3, %v2053_v51  ;;  %2246 = vst.msk [vmem:[%s3160_s22 + $0x3b8] sm:$0xff] %vm2126_vm3, %v2117_v52  ;;  %v1450_v55 = vpop.f32.mrf.mxu0  ;;  %v1706_v56 = vpop.f32.mrf.mxu1 }
 0x1df   : > { %vm1792_vm12 = vcmp.ge.f32.partialorder %v1449_v53, 0.0  ;;  %v1926_v58 = vmul.f32 %v3448_v59, %v1449_v53  ;;  %vm1856_vm13 = vcmp.ge.f32.partialorder %v1705_v54, 0.0  ;;  %v1990_v60 = vmul.f32 %v3448_v59, %v1705_v54 }
 0x1e0   : > { %v1451_v61 = vpop.f32.mrf.mxu0  ;;  %v1707_v62 = vpop.f32.mrf.mxu1 }
 0x1e1   : > { %v2054_v63 = vsel %vm1792_vm12, %v1449_v53, %v1926_v58  ;;  %v2118_v0 = vsel %vm1856_vm13, %v1705_v54, %v1990_v60  ;;  %v1452_v1 = vadd.f32 %v3455_v50, %v1451_v61  ;;  %v1708_v2 = vadd.f32 %v3455_v50, %v1707_v62 }
 0x1e2   : > { %2183 = vst.msk [vmem:[%s3160_s22 + $0x1c0] sm:$0xff] %vm2126_vm3, %v2054_v63  ;;  %2247 = vst.msk [vmem:[%s3160_s22 + $0x3c0] sm:$0xff] %vm2126_vm3, %v2118_v0  ;;  %v1453_v3 = vpop.f32.mrf.mxu0  ;;  %v1709_v4 = vpop.f32.mrf.mxu1 }
 0x1e3   : > { %vm1793_vm14 = vcmp.ge.f32.partialorder %v1452_v1, 0.0  ;;  %v1927_v5 = vmul.f32 %v3448_v59, %v1452_v1  ;;  %vm1857_vm15 = vcmp.ge.f32.partialorder %v1708_v2, 0.0  ;;  %v1991_v6 = vmul.f32 %v3448_v59, %v1708_v2 }
 0x1e4   : > { %v1456_v7 = vpop.f32.mrf.mxu0  ;;  %v1712_v8 = vpop.f32.mrf.mxu1 }
 0x1e5   : > { %v2055_v9 = vsel %vm1793_vm14, %v1452_v1, %v1927_v5  ;;  %v2119_v10 = vsel %vm1857_vm15, %v1708_v2, %v1991_v6  ;;  %v1457_v11 = vadd.f32 %v3455_v50, %v1456_v7  ;;  %v1713_v12 = vadd.f32 %v3455_v50, %v1712_v8 }
 0x1e6   : > { %2184 = vst.msk [vmem:[%s3160_s22 + $0x1c8] sm:$0xff] %vm2126_vm3, %v2055_v9  ;;  %2248 = vst.msk [vmem:[%s3160_s22 + $0x3c8] sm:$0xff] %vm2126_vm3, %v2119_v10  ;;  %v1458_v13 = vpop.f32.mrf.mxu0  ;;  %v1714_v14 = vpop.f32.mrf.mxu1 }
 0x1e7   : > { %vm1794_vm0 = vcmp.ge.f32.partialorder %v1457_v11, 0.0  ;;  %v1928_v15 = vmul.f32 %v3448_v59, %v1457_v11  ;;  %vm1858_vm1 = vcmp.ge.f32.partialorder %v1713_v12, 0.0  ;;  %v1992_v16 = vmul.f32 %v3448_v59, %v1713_v12 }
 0x1e8   : > { %v1459_v17 = vpop.f32.mrf.mxu0  ;;  %v1715_v18 = vpop.f32.mrf.mxu1 }
 0x1e9   : > { %v2056_v19 = vsel %vm1794_vm0, %v1457_v11, %v1928_v15  ;;  %v2120_v20 = vsel %vm1858_vm1, %v1713_v12, %v1992_v16  ;;  %v1460_v21 = vadd.f32 %v3455_v50, %v1459_v17  ;;  %v1716_v22 = vadd.f32 %v3455_v50, %v1715_v18 }
 0x1ea   : > { %2185 = vst.msk [vmem:[%s3160_s22 + $0x1d0] sm:$0xff] %vm2126_vm3, %v2056_v19  ;;  %2249 = vst.msk [vmem:[%s3160_s22 + $0x3d0] sm:$0xff] %vm2126_vm3, %v2120_v20  ;;  %v1461_v23 = vpop.f32.mrf.mxu0  ;;  %v1717_v24 = vpop.f32.mrf.mxu1 }
 0x1eb   : > { %vm1795_vm2 = vcmp.ge.f32.partialorder %v1460_v21, 0.0  ;;  %v1929_v25 = vmul.f32 %v3448_v59, %v1460_v21  ;;  %vm1859_vm4 = vcmp.ge.f32.partialorder %v1716_v22, 0.0  ;;  %v1993_v26 = vmul.f32 %v3448_v59, %v1716_v22 }
 0x1ec   : > { %v1464_v27 = vpop.f32.mrf.mxu0  ;;  %v1720_v28 = vpop.f32.mrf.mxu1 }
 0x1ed   : > { %v2057_v29 = vsel %vm1795_vm2, %v1460_v21, %v1929_v25  ;;  %v2121_v30 = vsel %vm1859_vm4, %v1716_v22, %v1993_v26  ;;  %v1465_v31 = vadd.f32 %v3455_v50, %v1464_v27  ;;  %v1721_v32 = vadd.f32 %v3455_v50, %v1720_v28 }
 0x1ee   : > { %2186 = vst.msk [vmem:[%s3160_s22 + $0x1d8] sm:$0xff] %vm2126_vm3, %v2057_v29  ;;  %2250 = vst.msk [vmem:[%s3160_s22 + $0x3d8] sm:$0xff] %vm2126_vm3, %v2121_v30  ;;  %v1466_v33 = vpop.f32.mrf.mxu0  ;;  %v1722_v34 = vpop.f32.mrf.mxu1 }
 0x1ef   : > { %vm1796_vm5 = vcmp.ge.f32.partialorder %v1465_v31, 0.0  ;;  %v1930_v35 = vmul.f32 %v3448_v59, %v1465_v31  ;;  %vm1860_vm6 = vcmp.ge.f32.partialorder %v1721_v32, 0.0  ;;  %v1994_v36 = vmul.f32 %v3448_v59, %v1721_v32 }
 0x1f0   : > { %v1467_v37 = vpop.f32.mrf.mxu0  ;;  %v1723_v38 = vpop.f32.mrf.mxu1 }
 0x1f1   : > { %v2058_v39 = vsel %vm1796_vm5, %v1465_v31, %v1930_v35  ;;  %v2122_v40 = vsel %vm1860_vm6, %v1721_v32, %v1994_v36  ;;  %v1468_v41 = vadd.f32 %v3455_v50, %v1467_v37  ;;  %v1724_v42 = vadd.f32 %v3455_v50, %v1723_v38 }
 0x1f2   : > { %2187 = vst.msk [vmem:[%s3160_s22 + $0x1e0] sm:$0xff] %vm2126_vm3, %v2058_v39  ;;  %2251 = vst.msk [vmem:[%s3160_s22 + $0x3e0] sm:$0xff] %vm2126_vm3, %v2122_v40  ;;  %v1469_v43 = vpop.f32.mrf.mxu0  ;;  %v1725_v44 = vpop.f32.mrf.mxu1 }
 0x1f3   : > { %vm1797_vm7 = vcmp.ge.f32.partialorder %v1468_v41, 0.0  ;;  %v1931_v45 = vmul.f32 %v3448_v59, %v1468_v41  ;;  %vm1861_vm8 = vcmp.ge.f32.partialorder %v1724_v42, 0.0  ;;  %v1995_v46 = vmul.f32 %v3448_v59, %v1724_v42 }
 0x1f4   : > { %v1472_v57 = vpop.f32.mrf.mxu0  ;;  %v1728_v47 = vpop.f32.mrf.mxu1 }
 0x1f5   : > { %v2059_v48 = vsel %vm1797_vm7, %v1468_v41, %v1931_v45  ;;  %v2123_v49 = vsel %vm1861_vm8, %v1724_v42, %v1995_v46  ;;  %v1473_v51 = vadd.f32 %v3455_v50, %v1472_v57  ;;  %v1729_v52 = vadd.f32 %v3455_v50, %v1728_v47 }
 0x1f6   : > { %2188 = vst.msk [vmem:[%s3160_s22 + $0x1e8] sm:$0xff] %vm2126_vm3, %v2059_v48  ;;  %2252 = vst.msk [vmem:[%s3160_s22 + $0x3e8] sm:$0xff] %vm2126_vm3, %v2123_v49  ;;  %v1474_v53 = vpop.f32.mrf.mxu0  ;;  %v1730_v54 = vpop.f32.mrf.mxu1 }
 0x1f7   : > { %vm1798_vm9 = vcmp.ge.f32.partialorder %v1473_v51, 0.0  ;;  %v1932_v55 = vmul.f32 %v3448_v59, %v1473_v51  ;;  %vm1862_vm10 = vcmp.ge.f32.partialorder %v1729_v52, 0.0  ;;  %v1996_v56 = vmul.f32 %v3448_v59, %v1729_v52 }
 0x1f8   : > { %v1475_v58 = vpop.f32.mrf.mxu0  ;;  %v1731_v60 = vpop.f32.mrf.mxu1 }
 0x1f9   : > { %v2060_v61 = vsel %vm1798_vm9, %v1473_v51, %v1932_v55  ;;  %v2124_v62 = vsel %vm1862_vm10, %v1729_v52, %v1996_v56  ;;  %v1476_v63 = vadd.f32 %v3455_v50, %v1475_v58  ;;  %v1732_v0 = vadd.f32 %v3455_v50, %v1731_v60 }
 0x1fa   : > { %2189 = vst.msk [vmem:[%s3160_s22 + $0x1f0] sm:$0xff] %vm2126_vm3, %v2060_v61  ;;  %2253 = vst.msk [vmem:[%s3160_s22 + $0x3f0] sm:$0xff] %vm2126_vm3, %v2124_v62  ;;  %v1477_v1 = vpop.f32.mrf.mxu0  ;;  %v1733_v2 = vpop.f32.mrf.mxu1 }
 0x1fb   : > { %vm1799_vm11 = vcmp.ge.f32.partialorder %v1476_v63, 0.0  ;;  %v1933_v3 = vmul.f32 %v3448_v59, %v1476_v63  ;;  %vm1863_vm12 = vcmp.ge.f32.partialorder %v1732_v0, 0.0  ;;  %v1997_v4 = vmul.f32 %v3448_v59, %v1732_v0 }
 0x1fd   : > { %v2061_v50 = vsel %vm1799_vm11, %v1476_v63, %v1933_v3  ;;  %v2125_v5 = vsel %vm1863_vm12, %v1732_v0, %v1997_v4 }
 0x1fe   : > { %2190 = vst.msk [vmem:[%s3160_s22 + $0x1f8] sm:$0xff] %vm2126_vm3, %v2061_v50  ;;  %2254 = vst.msk [vmem:[%s3160_s22 + $0x3f8] sm:$0xff] %vm2126_vm3, %v2125_v5 }
 0x1ff   : > { %2814 = shalt.err (!%p2811_p3)
}
 0x200   : > { %s2815_s9 = scalar_lea.hbm %s3726_s6, 16384  ;;  %s2819_s22 = scalar_lea.hbm %s3780_s4, 32768 }
 0x201   : > { %p2816_p4 = scmp.ne.s32.totalorder %s3726_s6, %s2815_s9  ;;  %p2820_p9 = scmp.lt.s32.totalorder %s3726_s6, %s3780_s4 }
 0x202   : > { %p2821_p10 = scmp.lt.s32.totalorder %s2819_s22, %s2815_s9 }
 0x203   : > { %p2817_p7 = pnand %p2816_p4, %p2931_p5 }
 0x204   : > { %p2822_p11 = por %p2821_p10, %p2820_p9 }
 0x205   : > { %p2818_p8 = pneg %p2817_p7 }
 0x207   : > { %p2823_p12 = pnand %p2822_p11, %p2818_p8 }
 0x209   : > { %2826 = shalt.err (!%p2823_p12)
}
 0x20a   : > { %s2866_s27 = smov 128   ;;  %s2867_s28 = smov 8  }
 0x20b   : > { %2570 = dma.vmem_to_hbm [thread:$0]  (%p2931_p5), %s3728_s30, 16384, %s3726_s6, %s3736_s7, %s2866_s27, %s2866_s27, %s2867_s28  }
 0x20c PF: > { %p2576_p13 = scmp.ge.s32.totalorder %s2861_s18, 2  ;;  %s2284_s29 = sand.u32 1, %s2849_s15  }
 0x20d   : > { %s2285_s19 = scalar_lea.sflag [#allocation3], %s2284_s29 }
 0x20e   : > { %p2573_p0 = pnand %p2576_p13, %p2935_p6 }
 0x210   : > { %p2574_p1 = pneg %p2573_p0 }
 0x212   : > { %2844 = dma.done.wait (%p2574_p1), %s2285_s19, 16384  }
 0x213   : > { %2846 = vsyncadd (%p2574_p1), %s2285_s19, 4294950912  ;;  %p14_p2 = scmp.ge.s32.totalorder %s2918_s21, 4   ;;  %s3783_s15 = smov %s2853_s16 }
 0x214   : > { %s3784_s16 = smov %s2857_s17  ;;  %s3785_s17 = smov %s2929_s24 }
 0x215   : > { %s3786_s18 = smov %s2918_s21  ;;  %16 = sbr.rel (!%p14_p2) target bundleno = 3 (0x3), region = 71 }
 0x21a   :  { %2290 = vsyncpa [#allocation3], 1 }
 0x21b   :  { %2292 = vsyncpa [#allocation3 + $0x1], 1 }

</bundles_post_ra>
